<compile_context>
chip_gen: v7x
topology: tpu7x:2x2x1
jax: 0.10.0
libtpu: 0.0.40
codegen_flags: <defaults>
</compile_context>

<pallas_src>
import functools

import jax
import jax.numpy as jnp
from jax import lax
from jax.experimental import pallas as pl
from jax.experimental.pallas import tpu as pltpu

NEG_INF = -1e30


def _round_up(x, m):
    return ((x + m - 1) // m) * m


# ----------------------------------------------------------------------------
# Fused kernel: cls_head MLP (+ optional bf16 logits) + per-row cross-entropy
# ----------------------------------------------------------------------------
def _classifier_kernel(x_ref, w1_ref, b1_ref, w2_ref, b2_ref, w3_ref, b3_ref,
                       lbl_ref, *out_refs, total_n, tile_n, emit_logits):
    if emit_logits:
        logits_ref, loss_rows_ref = out_refs
    else:
        (loss_rows_ref,) = out_refs

    i = pl.program_id(0)

    # ---- cls_head: (Linear+BN folded) -> ReLU -> (Linear+BN) -> ReLU -> Linear ----
    x = x_ref[...].astype(jnp.bfloat16)                         # in-kernel f32->bf16 cast (VPU)
    h1 = jnp.dot(x, w1_ref[...], preferred_element_type=jnp.float32) + b1_ref[...]
    h1 = jnp.maximum(h1, 0.0)                                   # f32 ReLU (VPU)
    h2 = jnp.dot(h1.astype(jnp.bfloat16), w2_ref[...],
                 preferred_element_type=jnp.float32) + b2_ref[...]
    h2 = jnp.maximum(h2, 0.0)
    logits = jnp.dot(h2.astype(jnp.bfloat16), w3_ref[...],
                     preferred_element_type=jnp.float32) + b3_ref[...]   # (T, KPAD) f32
    if emit_logits:
        logits_ref[...] = logits.astype(logits_ref.dtype)       # bf16, lane-dense store

    # ---- fused cross-entropy: per-row terms, reduced in JAX (keeps axis "parallel")
    kpad = logits.shape[-1]
    row0 = pl.multiple_of(i * tile_n, 8)
    labels = lbl_ref[pl.ds(row0, tile_n), :]                    # (T, 1) int32, VMEM-resident

    # Pad lanes carry b3 = -1e30, so plain max / logsumexp is already pad-safe.
    m = jnp.max(logits, axis=-1, keepdims=True)                 # (T, 1)
    lse = m + jnp.log(jnp.sum(jnp.exp(logits - m), axis=-1, keepdims=True))
    class_ids = lax.broadcasted_iota(jnp.int32, (tile_n, kpad), 1)
    onehot = (class_ids == labels).astype(jnp.float32)          # label=-1 / pad lanes never match
    picked = jnp.sum(onehot * logits, axis=-1, keepdims=True)   # (T, 1)

    row_ids = row0 + lax.broadcasted_iota(jnp.int32, (tile_n, 1), 0)
    row_valid = (row_ids < total_n) & (labels >= 0)             # ragged tile + ignore_index=-1
    loss_rows_ref[...] = jnp.where(row_valid, lse - picked, 0.0)


@functools.partial(jax.jit, static_argnames=("num_classes", "tile_n", "emit_logits"))
def classifier_forward(feat, labels, p, *, num_classes, tile_n=1024, emit_logits=True):
    """feat: [N, D] f32; labels: [N] int32 (-1 = ignore).

    Returns (padded bf16 logits [N, KPAD] or None, scalar mean CE loss)."""
    n, d = feat.shape
    kpad = p["w3"].shape[1]

    tile_n = _round_up(max(8, min(tile_n, _round_up(n, 8))), 8)
    num_tiles = pl.cdiv(n, tile_n)
    n_pad = num_tiles * tile_n

    labels2d = jnp.full((n_pad, 1), -1, jnp.int32).at[:n, 0].set(labels.astype(jnp.int32))

    const2d = lambda a: pl.BlockSpec(a.shape, lambda i: (0, 0))  # VMEM-resident (weights/labels)

    out_shape = [jax.ShapeDtypeStruct((n, 1), jnp.float32)]      # per-row loss terms
    out_specs = [pl.BlockSpec((tile_n, 1), lambda i: (i, 0))]
    if emit_logits:
        out_shape = [jax.ShapeDtypeStruct((n, kpad), jnp.bfloat16)] + out_shape
        out_specs = [pl.BlockSpec((tile_n, kpad), lambda i: (i, 0))] + out_specs

    # Keep vmem_limit_bytes in sync with the actual (double-buffered) working set.
    weight_bytes = sum(int(p[k].size) * p[k].dtype.itemsize
                       for k in ("w1", "b1", "w2", "b2", "w3", "b3"))
    vmem_bytes = (2 * tile_n * d * 4                      # feat tiles (f32, double-buffered)
                  + (2 * tile_n * kpad * 2 if emit_logits else 0)  # bf16 logits tiles
                  + 2 * tile_n * 4                        # per-row loss tiles
                  + 2 * weight_bytes                      # resident weights (2 buffers)
                  + 2 * n_pad * 4)                        # resident labels
    vmem_limit = int(min(100 * 1024 * 1024, max(32 * 1024 * 1024, 2 * vmem_bytes)))

    h1 = p["w1"].shape[1]
    h2 = p["w2"].shape[1]
    flops = 2 * n * (d * h1 + h1 * h2 + h2 * kpad)
    bytes_accessed = (n * d * 4 + (n * kpad * 2 if emit_logits else 0)
                      + n * 4 + n_pad * 4 + weight_bytes)

    kernel = functools.partial(_classifier_kernel, total_n=n, tile_n=tile_n,
                               emit_logits=emit_logits)

    outs = pl.pallas_call(
        kernel,
        out_shape=out_shape,
        grid=(num_tiles,),
        in_specs=[
            pl.BlockSpec((tile_n, d), lambda i: (i, 0)),         # feat tile (f32)
            const2d(p["w1"]), const2d(p["b1"]),
            const2d(p["w2"]), const2d(p["b2"]),
            const2d(p["w3"]), const2d(p["b3"]),
            const2d(labels2d),                                   # VMEM-resident labels
        ],
        out_specs=out_specs,
        compiler_params=pltpu.CompilerParams(
            dimension_semantics=("parallel",),                   # no cross-step carry -> megacore OK
            vmem_limit_bytes=vmem_limit,
        ),
        cost_estimate=pl.CostEstimate(
            flops=flops, transcendentals=n * (kpad + 1), bytes_accessed=bytes_accessed,
        ),
    )(feat, p["w1"], p["b1"], p["w2"], p["b2"], p["w3"], p["b3"], labels2d)

    if emit_logits:
        logits_pad, loss_rows = outs
    else:
        logits_pad, (loss_rows,) = None, outs

    valid = jnp.sum((labels >= 0).astype(jnp.float32))
    # NOTE: if every label is ignored, PyTorch returns NaN; we return 0.0 (clamped divisor).
    loss = jnp.sum(loss_rows) / jnp.maximum(valid, 1.0)
    return logits_pad, loss


# ----------------------------------------------------------------------------
# Parameter prep: fold eval-mode BatchNorm into the Linears, pad classes to 128
# (pad-lane mask folded into b3 as -1e30 so the kernel needs no lane masking)
# ----------------------------------------------------------------------------
def fold_and_pad_params(raw, num_classes, eps=1e-5):
    def fold(w, b, g, beta, mean, var):
        scale = g / jnp.sqrt(var + eps)
        return w * scale[None, :], (b - mean) * scale + beta

    w1, c1 = fold(raw["w1"], raw["b1"], raw["bn1_g"], raw["bn1_b"], raw["bn1_m"], raw["bn1_v"])
    w2, c2 = fold(raw["w2"], raw["b2"], raw["bn2_g"], raw["bn2_b"], raw["bn2_m"], raw["bn2_v"])
    w3, c3 = raw["w3"], raw["b3"]

    kpad = max(128, _round_up(num_classes, 128))
    hdim = w3.shape[0]
    w3p = jnp.zeros((hdim, kpad), w3.dtype).at[:, :num_classes].set(w3)
    c3p = jnp.full((kpad,), NEG_INF, jnp.float32).at[:num_classes].set(c3.astype(jnp.float32))

    return dict(
        w1=w1.astype(jnp.bfloat16), b1=c1.reshape(1, -1).astype(jnp.float32),
        w2=w2.astype(jnp.bfloat16), b2=c2.reshape(1, -1).astype(jnp.float32),
        w3=w3p.astype(jnp.bfloat16), b3=c3p.reshape(1, -1).astype(jnp.float32),
    )


# ----------------------------------------------------------------------------
# DefaultClassifier wrapper (eval-mode semantics of the PyTorch module)
# ----------------------------------------------------------------------------
class DefaultClassifier:
    def __init__(self, params, num_classes=40, training=False, tile_n=1024):
        self.params = params
        self.num_classes = num_classes
        self.training = training
        self.tile_n = tile_n

    def __call__(self, input_dict):
        # TODO(synk): the config-built backbone (point encoder + pooling) is not
        # translated; input_dict["feat"] is taken as the backbone's [N, embed_dim] output.
        feat = input_dict["feat"]
        has_labels = "category" in input_dict
        labels = (input_dict["category"] if has_labels
                  else jnp.full((feat.shape[0],), -1, jnp.int32))
        if self.training:
            # TODO(synk): train-mode BatchNorm batch-statistics and Dropout(p=0.5) have no
            # equivalent here; eval-mode folded stats are used.  Loss-only (no logits writeback).
            _, loss = classifier_forward(feat, labels, self.params,
                                         num_classes=self.num_classes,
                                         tile_n=self.tile_n, emit_logits=False)
            return dict(loss=loss)
        logits_pad, loss = classifier_forward(feat, labels, self.params,
                                              num_classes=self.num_classes,
                                              tile_n=self.tile_n, emit_logits=True)
        cls_logits = logits_pad[:, :self.num_classes]   # lazy slice at the consumer (bf16)
        if has_labels:
            return dict(loss=loss, cls_logits=cls_logits)
        return dict(cls_logits=cls_logits)


if __name__ == "__main__":
    # Shapes consistent with the module: embed_dim=256, head 256->256->128->40.
    N, D, H1, H2, NUM_CLASSES = 200, 256, 256, 128, 40
    EPS = 1e-5

    key = jax.random.PRNGKey(0)
    ks = jax.random.split(key, 16)
    feat = jax.random.normal(ks[0], (N, D), dtype=jnp.float32)
    category = jax.random.randint(ks[1], (N,), 0, NUM_CLASSES, dtype=jnp.int32)
    category = category.at[5].set(-1)   # exercise ignore_index=-1

    raw = dict(
        w1=jax.random.normal(ks[2], (D, H1)) * 0.05,
        b1=jax.random.normal(ks[3], (H1,)) * 0.01,
        bn1_g=1.0 + 0.1 * jax.random.normal(ks[4], (H1,)),
        bn1_b=0.1 * jax.random.normal(ks[5], (H1,)),
        bn1_m=0.1 * jax.random.normal(ks[6], (H1,)),
        bn1_v=jnp.abs(1.0 + 0.1 * jax.random.normal(ks[7], (H1,))),
        w2=jax.random.normal(ks[8], (H1, H2)) * 0.05,
        b2=jax.random.normal(ks[9], (H2,)) * 0.01,
        bn2_g=1.0 + 0.1 * jax.random.normal(ks[10], (H2,)),
        bn2_b=0.1 * jax.random.normal(ks[11], (H2,)),
        bn2_m=0.1 * jax.random.normal(ks[12], (H2,)),
        bn2_v=jnp.abs(1.0 + 0.1 * jax.random.normal(ks[13], (H2,))),
        w3=jax.random.normal(ks[14], (H2, NUM_CLASSES)) * 0.05,
        b3=jax.random.normal(ks[15], (NUM_CLASSES,)) * 0.01,
    )

    params = fold_and_pad_params(raw, NUM_CLASSES, eps=EPS)
    # Small tile_n forces a multi-step grid (with a ragged last tile) in this small test.
    model = DefaultClassifier(params, num_classes=NUM_CLASSES, training=False, tile_n=128)
    out = model(dict(feat=feat, category=category))
    jax.block_until_ready(out["cls_logits"])
    jax.block_until_ready(out["loss"])
    logits_f32 = out["cls_logits"].astype(jnp.float32)

    # Loss-only (training) path must agree with eval loss (same folded eval-mode stats).
    out_tr = DefaultClassifier(params, num_classes=NUM_CLASSES, training=True, tile_n=128)(
        dict(feat=feat, category=category))
    jax.block_until_ready(out_tr["loss"])

    # No-label path (logits only).
    out_nl = model(dict(feat=feat))
    assert "loss" not in out_nl and out_nl["cls_logits"].shape == (N, NUM_CLASSES)

    def ce_loss(logits, labels):
        lse = jax.scipy.special.logsumexp(logits, axis=-1)
        safe = jnp.clip(labels, 0, NUM_CLASSES - 1)
        picked = jnp.take_along_axis(logits, safe[:, None], axis=-1)[:, 0]
        valid = labels >= 0
        return jnp.sum(jnp.where(valid, lse - picked, 0.0)) / jnp.maximum(valid.sum(), 1)

    # ---- Reference 1 (tight): same folded/padded bf16 weights, f32 math --------
    w1r = params["w1"].astype(jnp.float32); b1r = params["b1"]
    w2r = params["w2"].astype(jnp.float32); b2r = params["b2"]
    w3r = params["w3"].astype(jnp.float32); b3r = params["b3"]
    xr = feat.astype(jnp.bfloat16).astype(jnp.float32)
    h1r = jnp.maximum(xr @ w1r + b1r, 0.0)
    h2r = jnp.maximum(h1r.astype(jnp.bfloat16).astype(jnp.float32) @ w2r + b2r, 0.0)
    logits_ref = (h2r.astype(jnp.bfloat16).astype(jnp.float32) @ w3r + b3r)[:, :NUM_CLASSES]
    loss_ref = ce_loss(logits_ref, category)

    assert jnp.allclose(logits_f32, logits_ref, atol=2e-2, rtol=2e-2)
    assert jnp.allclose(out["loss"], loss_ref, atol=5e-3, rtol=5e-3)
    assert jnp.allclose(out_tr["loss"], out["loss"], atol=1e-5, rtol=1e-5)

    # ---- Reference 2 (loose): raw f32 params, explicit eval-mode BatchNorm -----
    def bn(x, g, b, m, v):
        return (x - m) / jnp.sqrt(v + EPS) * g + b
    hf = jnp.maximum(bn(feat @ raw["w1"] + raw["b1"], raw["bn1_g"], raw["bn1_b"],
                        raw["bn1_m"], raw["bn1_v"]), 0.0)
    hf = jnp.maximum(bn(hf @ raw["w2"] + raw["b2"], raw["bn2_g"], raw["bn2_b"],
                        raw["bn2_m"], raw["bn2_v"]), 0.0)
    logits_raw = hf @ raw["w3"] + raw["b3"]
    loss_raw = ce_loss(logits_raw, category)

    assert jnp.allclose(logits_f32, logits_raw, atol=8e-2, rtol=8e-2)
    assert jnp.allclose(out["loss"], loss_raw, atol=5e-2, rtol=5e-2)

    print("KERNEL_OK")
</pallas_src>

<mosaic_0001>
module attributes {stable_mosaic.version = 11 : i64} {
  func.func @_classifier_kernel(%arg0: i32, %arg1: memref<128x256xf32, #tpu.memory_space<vmem>>, %arg2: memref<256x256xbf16, #tpu.memory_space<vmem>>, %arg3: memref<1x256xf32, #tpu.memory_space<vmem>>, %arg4: memref<256x128xbf16, #tpu.memory_space<vmem>>, %arg5: memref<1x128xf32, #tpu.memory_space<vmem>>, %arg6: memref<128x128xbf16, #tpu.memory_space<vmem>>, %arg7: memref<1x128xf32, #tpu.memory_space<vmem>>, %arg8: memref<256x1xi32, #tpu.memory_space<vmem>>, %arg9: memref<128x128xbf16, #tpu.memory_space<vmem>>, %arg10: memref<128x1xf32, #tpu.memory_space<vmem>>) attributes {dimension_semantics = [#tpu.dimension_semantics<parallel>], iteration_bounds = array<i64: 2>, scalar_prefetch = 0 : i64, scratch_operands = 0 : i64, tpu.core_type = #tpu.core_type<tc>, window_params = [{transform_indices = @transform_0, window_bounds = array<i64: 128, 256>}, {pipeline_mode = #tpu.pipeline_mode<synchronous>, transform_indices = @transform_1, window_bounds = array<i64: 256, 256>}, {pipeline_mode = #tpu.pipeline_mode<synchronous>, transform_indices = @transform_2, window_bounds = array<i64: 1, 256>}, {pipeline_mode = #tpu.pipeline_mode<synchronous>, transform_indices = @transform_3, window_bounds = array<i64: 256, 128>}, {pipeline_mode = #tpu.pipeline_mode<synchronous>, transform_indices = @transform_4, window_bounds = array<i64: 1, 128>}, {pipeline_mode = #tpu.pipeline_mode<synchronous>, transform_indices = @transform_5, window_bounds = array<i64: 128, 128>}, {pipeline_mode = #tpu.pipeline_mode<synchronous>, transform_indices = @transform_6, window_bounds = array<i64: 1, 128>}, {pipeline_mode = #tpu.pipeline_mode<synchronous>, transform_indices = @transform_7, window_bounds = array<i64: 256, 1>}, {transform_indices = @transform_8, window_bounds = array<i64: 128, 128>}, {transform_indices = @transform_9, window_bounds = array<i64: 128, 1>}]} {
    %c0 = arith.constant 0 : index
    %c0_0 = arith.constant 0 : index
    %0 = vector.load %arg1[%c0, %c0_0] : memref<128x256xf32, #tpu.memory_space<vmem>>, vector<128x256xf32>
    %1 = arith.truncf %0 : vector<128x256xf32> to vector<128x256xbf16>
    %c0_1 = arith.constant 0 : index
    %c0_2 = arith.constant 0 : index
    %2 = vector.load %arg2[%c0_1, %c0_2] : memref<256x256xbf16, #tpu.memory_space<vmem>>, vector<256x256xbf16>
    %cst = arith.constant dense<0.000000e+00> : vector<128x256xf32>
    %3 = tpu.matmul %1, %2, %cst {dimension_numbers = #tpu.dot_dimension_numbers<[1], [0], [0], [1], [0, 0, 1, 1], [], []>} : vector<128x256xbf16>, vector<256x256xbf16>, vector<128x256xf32> -> vector<128x256xf32>
    %c0_3 = arith.constant 0 : index
    %c0_4 = arith.constant 0 : index
    %4 = vector.load %arg3[%c0_3, %c0_4] : memref<1x256xf32, #tpu.memory_space<vmem>>, vector<1x256xf32>
    %5 = vector.broadcast %4 : vector<1x256xf32> to vector<128x256xf32>
    %6 = arith.addf %3, %5 : vector<128x256xf32>
    %cst_5 = arith.constant 0.000000e+00 : f32
    %7 = vector.broadcast %cst_5 : f32 to vector<128x256xf32>
    %8 = arith.maximumf %6, %7 : vector<128x256xf32>
    %9 = arith.truncf %8 : vector<128x256xf32> to vector<128x256xbf16>
    %c0_6 = arith.constant 0 : index
    %c0_7 = arith.constant 0 : index
    %10 = vector.load %arg4[%c0_6, %c0_7] : memref<256x128xbf16, #tpu.memory_space<vmem>>, vector<256x128xbf16>
    %cst_8 = arith.constant dense<0.000000e+00> : vector<128x128xf32>
    %11 = tpu.matmul %9, %10, %cst_8 {dimension_numbers = #tpu.dot_dimension_numbers<[1], [0], [0], [1], [0, 0, 1, 1], [], []>} : vector<128x256xbf16>, vector<256x128xbf16>, vector<128x128xf32> -> vector<128x128xf32>
    %c0_9 = arith.constant 0 : index
    %c0_10 = arith.constant 0 : index
    %12 = vector.load %arg5[%c0_9, %c0_10] : memref<1x128xf32, #tpu.memory_space<vmem>>, vector<1x128xf32>
    %13 = vector.broadcast %12 : vector<1x128xf32> to vector<128x128xf32>
    %14 = arith.addf %11, %13 : vector<128x128xf32>
    %cst_11 = arith.constant 0.000000e+00 : f32
    %15 = vector.broadcast %cst_11 : f32 to vector<128x128xf32>
    %16 = arith.maximumf %14, %15 : vector<128x128xf32>
    %17 = arith.truncf %16 : vector<128x128xf32> to vector<128x128xbf16>
    %c0_12 = arith.constant 0 : index
    %c0_13 = arith.constant 0 : index
    %18 = vector.load %arg6[%c0_12, %c0_13] : memref<128x128xbf16, #tpu.memory_space<vmem>>, vector<128x128xbf16>
    %cst_14 = arith.constant dense<0.000000e+00> : vector<128x128xf32>
    %19 = tpu.matmul %17, %18, %cst_14 {dimension_numbers = #tpu.dot_dimension_numbers<[1], [0], [0], [1], [0, 0, 1, 1], [], []>} : vector<128x128xbf16>, vector<128x128xbf16>, vector<128x128xf32> -> vector<128x128xf32>
    %c0_15 = arith.constant 0 : index
    %c0_16 = arith.constant 0 : index
    %20 = vector.load %arg7[%c0_15, %c0_16] : memref<1x128xf32, #tpu.memory_space<vmem>>, vector<1x128xf32>
    %21 = vector.broadcast %20 : vector<1x128xf32> to vector<128x128xf32>
    %22 = arith.addf %19, %21 : vector<128x128xf32>
    %23 = arith.truncf %22 : vector<128x128xf32> to vector<128x128xbf16>
    %c0_17 = arith.constant 0 : index
    %c0_18 = arith.constant 0 : index
    %24 = vector.load %arg9[%c0_17, %c0_18] : memref<128x128xbf16, #tpu.memory_space<vmem>>, vector<128x128xbf16>
    tpu.vector_store %arg9[%c0_17, %c0_18], %23 {strides = array<i32>} : memref<128x128xbf16, #tpu.memory_space<vmem>>, vector<128x128xbf16>,
    %c128_i32 = arith.constant 128 : i32
    %25 = arith.muli %arg0, %c128_i32 : i32
    %26 = tpu.assume_multiple %25, 8 : i32
    %27 = arith.index_cast %26 : i32 to index
    %c0_19 = arith.constant 0 : index
    %28 = vector.load %arg8[%27, %c0_19] : memref<256x1xi32, #tpu.memory_space<vmem>>, vector<128x1xi32>
    %cst_20 = arith.constant dense<0xFF800000> : vector<128xf32>
    %29 = vector.multi_reduction <maximumf>, %22, %cst_20 [1] : vector<128x128xf32> to vector<128xf32>
    %30 = vector.shape_cast %29 : vector<128xf32> to vector<128x1xf32>
    %31 = vector.broadcast %30 : vector<128x1xf32> to vector<128x128xf32>
    %32 = arith.subf %22, %31 : vector<128x128xf32>
    %33 = math.exp %32 : vector<128x128xf32>
    %cst_21 = arith.constant dense<0.000000e+00> : vector<128xf32>
    %34 = vector.multi_reduction <add>, %33, %cst_21 [1] : vector<128x128xf32> to vector<128xf32>
    %35 = vector.shape_cast %34 : vector<128xf32> to vector<128x1xf32>
    %36 = math.log %35 : vector<128x1xf32>
    %37 = arith.addf %30, %36 : vector<128x1xf32>
    %38 = tpu.iota {dimensions = array<i32: 1>} : vector<128x128xi32>
    %39 = vector.broadcast %28 : vector<128x1xi32> to vector<128x128xi32>
    %40 = arith.cmpi eq, %38, %39 : vector<128x128xi32>
    %41 = arith.extui %40 : vector<128x128xi1> to vector<128x128xi32>
    %42 = arith.sitofp %41 : vector<128x128xi32> to vector<128x128xf32>
    %43 = arith.mulf %42, %22 : vector<128x128xf32>
    %cst_22 = arith.constant dense<0.000000e+00> : vector<128xf32>
    %44 = vector.multi_reduction <add>, %43, %cst_22 [1] : vector<128x128xf32> to vector<128xf32>
    %45 = vector.shape_cast %44 : vector<128xf32> to vector<128x1xf32>
    %46 = tpu.iota {dimensions = array<i32: 0>} : vector<128x1xi32>
    %47 = vector.broadcast %26 : i32 to vector<128x1xi32>
    %48 = arith.addi %47, %46 : vector<128x1xi32>
    %c200_i32 = arith.constant 200 : i32
    %49 = vector.broadcast %c200_i32 : i32 to vector<128x1xi32>
    %50 = arith.cmpi slt, %48, %49 : vector<128x1xi32>
    %c0_i32 = arith.constant 0 : i32
    %51 = vector.broadcast %c0_i32 : i32 to vector<128x1xi32>
    %52 = arith.cmpi sge, %28, %51 : vector<128x1xi32>
    %53 = arith.andi %50, %52 : vector<128x1xi1>
    %54 = arith.subf %37, %45 : vector<128x1xf32>
    %cst_23 = arith.constant 0.000000e+00 : f32
    %55 = vector.broadcast %cst_23 : f32 to vector<128x1xf32>
    %56 = arith.select %53, %54, %55 : vector<128x1xi1>, vector<128x1xf32>
    %c0_24 = arith.constant 0 : index
    %c0_25 = arith.constant 0 : index
    %57 = vector.load %arg10[%c0_24, %c0_25] : memref<128x1xf32, #tpu.memory_space<vmem>>, vector<128x1xf32>
    tpu.vector_store %arg10[%c0_24, %c0_25], %56 {strides = array<i32>} : memref<128x1xf32, #tpu.memory_space<vmem>>, vector<128x1xf32>,
    return
  }
  func.func @transform_0(%arg0: i32) -> (i32, i32) {
    %c0_i32 = arith.constant 0 : i32
    %c0_i32_0 = arith.constant 0 : i32
    return %arg0, %c0_i32 : i32, i32
  }
  func.func @transform_1(%arg0: i32) -> (i32, i32) {
    %c0_i32 = arith.constant 0 : i32
    %c0_i32_0 = arith.constant 0 : i32
    %c0_i32_1 = arith.constant 0 : i32
    return %c0_i32, %c0_i32_0 : i32, i32
  }
  func.func @transform_2(%arg0: i32) -> (i32, i32) {
    %c0_i32 = arith.constant 0 : i32
    %c0_i32_0 = arith.constant 0 : i32
    %c0_i32_1 = arith.constant 0 : i32
    return %c0_i32, %c0_i32_0 : i32, i32
  }
  func.func @transform_3(%arg0: i32) -> (i32, i32) {
    %c0_i32 = arith.constant 0 : i32
    %c0_i32_0 = arith.constant 0 : i32
    %c0_i32_1 = arith.constant 0 : i32
    return %c0_i32, %c0_i32_0 : i32, i32
  }
  func.func @transform_4(%arg0: i32) -> (i32, i32) {
    %c0_i32 = arith.constant 0 : i32
    %c0_i32_0 = arith.constant 0 : i32
    %c0_i32_1 = arith.constant 0 : i32
    return %c0_i32, %c0_i32_0 : i32, i32
  }
  func.func @transform_5(%arg0: i32) -> (i32, i32) {
    %c0_i32 = arith.constant 0 : i32
    %c0_i32_0 = arith.constant 0 : i32
    %c0_i32_1 = arith.constant 0 : i32
    return %c0_i32, %c0_i32_0 : i32, i32
  }
  func.func @transform_6(%arg0: i32) -> (i32, i32) {
    %c0_i32 = arith.constant 0 : i32
    %c0_i32_0 = arith.constant 0 : i32
    %c0_i32_1 = arith.constant 0 : i32
    return %c0_i32, %c0_i32_0 : i32, i32
  }
  func.func @transform_7(%arg0: i32) -> (i32, i32) {
    %c0_i32 = arith.constant 0 : i32
    %c0_i32_0 = arith.constant 0 : i32
    %c0_i32_1 = arith.constant 0 : i32
    return %c0_i32, %c0_i32_0 : i32, i32
  }
  func.func @transform_8(%arg0: i32) -> (i32, i32) {
    %c0_i32 = arith.constant 0 : i32
    %c0_i32_0 = arith.constant 0 : i32
    return %arg0, %c0_i32 : i32, i32
  }
  func.func @transform_9(%arg0: i32) -> (i32, i32) {
    %c0_i32 = arith.constant 0 : i32
    %c0_i32_0 = arith.constant 0 : i32
    return %arg0, %c0_i32 : i32, i32
  }
}

</mosaic_0001>

<bundles_post_ra>
// kernel: classifier_forward.1
= control target key start
LH: loop header
LB: loop body
LE: loop exit
PB: predicated region body
PF: predicated region fallthrough
CT: control target
= control target key end

     0   :  { %15 = vsyncpa [#allocation3], 0  ;;  %s3893_s0 = inlined_call_operand.vmem [shape: f32[200,256], index: 0, kind: input, shape index: {}]   ;;  %s3894_s1 = inlined_call_operand.vmem [shape: bf16[256,256], index: 1, kind: input, shape index: {}]   ;;  %s3895_s2 = inlined_call_operand.vmem [shape: f32[1,256], index: 2, kind: input, shape index: {}]   ;;  %s3896_s3 = inlined_call_operand.hbm [shape: bf16[256,128], index: 3, kind: input, shape index: {}]   ;;  %s3897_s4 = inlined_call_operand.vmem [shape: f32[1,128], index: 4, kind: input, shape index: {}]   ;;  %s3898_s5 = inlined_call_operand.hbm [shape: bf16[128,128], index: 5, kind: input, shape index: {}]   ;;  %s3899_s6 = inlined_call_operand.vmem [shape: f32[1,128], index: 6, kind: input, shape index: {}]   ;;  %s3900_s7 = inlined_call_operand.vmem [shape: s32[256,1], index: 7, kind: input, shape index: {}]   ;;  %s3901_s8 = inlined_call_operand.hbm [shape: bf16[200,128], index: 8, kind: output, shape index: {0}]   ;;  %s3902_s9 = inlined_call_operand.vmem [shape: f32[200,1], index: 9, kind: output, shape index: {1}]  }
   0x1   :  { %16 = vsyncpa [#allocation6], 0 }
   0x2   :  { %17 = vsyncpa [#allocation4], 0 }
   0x3   :  { %19 = vsyncpa [#allocation4 + $0x1], 0  ;;  %s2965_s30 = smov 0   ;;  %s2967_s10 = smov 0  }
   0x4   :  { %s2969_s11 = smov 0   ;;  %s2971_s12 = smov 0  }
   0x5 LB: > { %3908 = sst [smem:[#allocation12_spill]] %s2868_s11  ;;  %s2986_s13 = sadd.s32 4294967295, %s2872_s12   ;;  %s2872_s12 = sphi %s2971_s12, %s3957_s12   ;;  %s2868_s11 = sphi %s2969_s11, %s3959_s11   ;;  %s2864_s10 = sphi %s2967_s10, %s3961_s10   ;;  %s2860_s30 = sphi %s2965_s30, %s3960_s30  }
   0x6   : > { %s2139_s14 = sadd.s32 4294967294, %s2872_s12   ;;  %s2990_s15 = sadd.s32 1, %s2872_s12  }
   0x7   : > { %3909 = sst [smem:[#allocation13_spill]] %s2990_s15  ;;  %s205_s16 = sadd.s32 1, %s2868_s11 }
   0x8   : > { %s202_s17 = ssub.s32 %s2872_s12, %s2990_s15  ;;  %p215_p0 = scmp.ne.s32.totalorder %s2868_s11, %s2864_s10 }
   0x9   : > { %p203_p1 = scmp.eq.s32.totalorder %s202_s17, 0  ;;  %p216_p2 = scmp.eq.s32.totalorder %s2986_s13, 1 }
   0xa   : > { %p221_p3 = scmp.ne.s32.totalorder %s2864_s10, %s2860_s30  ;;  %p222_p4 = scmp.eq.s32.totalorder %s2139_s14, 1 }
   0xb   : > { %s3001_s18 = scalar_select %p203_p1, %s2868_s11, %s205_s16  }
   0xc   : > { %p3003_p5 = por %p216_p2, %p215_p0  ;;  %p3007_p6 = por %p222_p4, %p221_p3 }
   0xd   : > { %3910 = sst [smem:[#allocation14_spill]] %s3001_s18  ;;  %p2140_p7 = scmp.ge.s32.totalorder %s2872_s12, 1 }
   0xe   : > { %s3911_s19 = scalar_select %p3003_p5, 1, 0 }
   0xf   : > { %s3912_s20 = scalar_select %p3007_p6, 1, 0 }
  0x10   : > { %p255_p8 = scmp.lt.s32.totalorder %s2872_s12, 3  ;;  %p3903_p9 = scmp.eq.s32.totalorder %s2986_s13, 0 }
  0x11   : > { %s2906_s22 = smov [#allocation2]   ;;  %s2907_s25 = smov [#allocation5]  }
  0x12   : > { %p3014_p10 = pnand %p2140_p7, %p255_p8  ;;  %s273_s23 = sshll.u32 %s2906_s22, 4  ;;  %s274_s23 = int_to_ptr.vmem [resolvable:$true] %s273_s23 }
  0x13   : > { %s289_s26 = sshll.u32 %s2907_s25, 4  ;;  %s2714_s29 = scalar_lea.hbm %s3896_s3, 2048  ;;  %s3026_s26 = int_to_ptr.vmem [resolvable:$true] %s289_s26 }
  0x14   : > { %s3913_s21 = scalar_select %p3014_p10, 1, 0 }
  0x15   : > { %p2456_p11 = pneg %p3014_p10  ;;  %p2715_p13 = scmp.ne.s32.totalorder %s3896_s3, %s2714_s29 }
  0x16   : > { %p2721_p3 = scmp.lt.u32.totalorder %s2714_s29, %s3896_s3 }
  0x17   : > { %p3022_p12 = pnand %p3903_p9, %p2456_p11 }
  0x19   : > { %p2716_p0 = pneg %p3022_p12 }
  0x1b   : > { %p2717_p1 = pnand %p2716_p0, %p2715_p13 }
  0x1d   : > { %p2718_p2 = pneg %p2717_p1 }
  0x1f   : > { %p2723_p4 = pnand %p2721_p3, %p2718_p2 }
  0x21   : > { %2726 = shalt.err (!%p2723_p4)
}
  0x22   : > { %s2727_s25 = scalar_lea.vmem %s274_s23, 2048  ;;  %p2735_p9 = scmp.lt.s32.totalorder %s274_s23, %s274_s23 }
  0x23   : > { %p2728_p7 = scmp.ne.s32.totalorder %s274_s23, %s2727_s25  ;;  %p2736_p6 = scmp.lt.s32.totalorder %s2727_s25, %s2727_s25 }
  0x25   : > { %p2730_p8 = pnand %p2728_p7, %p2716_p0  ;;  %p2737_p5 = por %p2736_p6, %p2735_p9 }
  0x27   : > { %p2731_p11 = pneg %p2730_p8 }
  0x29   : > { %p2738_p10 = pnand %p2737_p5, %p2731_p11 }
  0x2b   : > { %2741 = shalt.err (!%p2738_p10)
}
  0x2c   : > { %s2908_s27 = smov 64   ;;  %s2909_s28 = smov 4  }
  0x2d   : > { %2459 = dma.hbm_to_vmem [thread:$0]  (!%p3022_p12), %s3896_s3, 2048, %s274_s23, [#allocation3], %s2908_s27, %s2908_s27, %s2909_s28  }
  0x2e   : > { %s2742_s22 = scalar_lea.hbm %s3898_s5, 1024 }
  0x2f   : > { %p2743_p13 = scmp.ne.s32.totalorder %s3898_s5, %s2742_s22  ;;  %p2749_p9 = scmp.lt.u32.totalorder %s2742_s22, %s3898_s5 }
  0x31   : > { %p2745_p5 = pnand %p2743_p13, %p2716_p0 }
  0x33   : > { %p2746_p6 = pneg %p2745_p5 }
  0x35   : > { %p2751_p10 = pnand %p2749_p9, %p2746_p6 }
  0x37   : > { %2754 = shalt.err (!%p2751_p10)
}
  0x38   : > { %s2755_s23 = scalar_lea.vmem %s3026_s26, 1024  ;;  %p2763_p4 = scmp.lt.s32.totalorder %s3026_s26, %s3026_s26 }
  0x39   : > { %p2756_p1 = scmp.ne.s32.totalorder %s3026_s26, %s2755_s23  ;;  %p2764_p7 = scmp.lt.s32.totalorder %s2755_s23, %s2755_s23 }
  0x3b   : > { %p2758_p2 = pnand %p2756_p1, %p2716_p0  ;;  %p2765_p8 = por %p2764_p7, %p2763_p4 }
  0x3d   : > { %p2759_p3 = pneg %p2758_p2 }
  0x3f   : > { %p2766_p11 = pnand %p2765_p8, %p2759_p3 }
  0x41   : > { %2769 = shalt.err (!%p2766_p11)
}
  0x42   : > { %2462 = dma.hbm_to_vmem [thread:$0]  (!%p3022_p12), %s3898_s5, 1024, %s3026_s26, [#allocation6], %s2908_s27, %s2908_s27, %s2909_s28  }
  0x43   : > { %p3915_p13 = scmp.ne.s32.totalorder %s3913_s21, 0 }
  0x44   : > { %p3916_p5 = scmp.eq.s32.totalorder (!%p3915_p13), %s2986_s13, 0 }
  0x45   : > { %331 = sbr.rel (%p3915_p13) target bundleno = 1272 (0x4f8), region = 52 }
  0x4c   : > { %2847 = dma.done.wait (%p3916_p5), [#allocation3], 2048   ;;  %p3917_p0 = pmov %p3916_p5 }
  0x4e   : > { %2849 = vsyncadd (%p3917_p0), [#allocation3], 4294965248  ;;  %p3918_p6 = pmov %p3917_p0 }
  0x4f   : > { %p3919_p9 = pmov %p3917_p0 }
  0x50   : > { %2851 = dma.done.wait (%p3918_p6), [#allocation6], 1024  }
  0x51   : > { %2853 = vsyncadd (%p3919_p9), [#allocation6], 4294966272  ;;  %v2578_v0 = vld [vmem:[%s3894_s1 + $0x4] ss:$8 sps:$4 sm:$0xff]   ;;  %v2580_v1 = vld [vmem:[%s3894_s1] ss:$8 sps:$4 sm:$0xff]  }
  0x52   : > { %661 = vmatprep.subr.bf16.mxu0 %v2578_v0  ;;  %v2581_v2 = vld [vmem:[%s3894_s1 + $0x14] ss:$8 sps:$4 sm:$0xff]   ;;  %v2583_v3 = vld [vmem:[%s3894_s1 + $0x10] ss:$8 sps:$4 sm:$0xff]   ;;  %v2584_v4 = vld [vmem:[%s3894_s1 + $0x24] ss:$8 sps:$4 sm:$0xff]  }
  0x53   : > { %662 = vmatpush1.bf16.msra.mxu0 %v2580_v1  ;;  %s3101_s22 = sshll.u32 %s2986_s13, 4  ;;  %v2586_v5 = vld [vmem:[%s3894_s1 + $0x20] ss:$8 sps:$4 sm:$0xff]   ;;  %v2587_v6 = vld [vmem:[%s3894_s1 + $0x34] ss:$8 sps:$4 sm:$0xff]   ;;  %s3268_s21 = sshll.u32 %s2986_s13, 7 }
  0x54   : > { %663 = vmatprep.subr.bf16.mxu0 %v2581_v2  ;;  %p387_p12 = scmp.lt.s32.totalorder %s3101_s22, 24  ;;  %v2589_v7 = vld [vmem:[%s3894_s1 + $0x30] ss:$8 sps:$4 sm:$0xff]   ;;  %v2590_v8 = vld [vmem:[%s3894_s1 + $0x44] ss:$8 sps:$4 sm:$0xff]   ;;  %s3277_s29 = scalar_lea.vmem %s3900_s7, %s3268_s21 }
  0x55   : > { %v2592_v9 = vld [vmem:[%s3894_s1 + $0x40] ss:$8 sps:$4 sm:$0xff]   ;;  %v2593_v10 = vld [vmem:[%s3894_s1 + $0x54] ss:$8 sps:$4 sm:$0xff]   ;;  %v2595_v11 = vld [vmem:[%s3894_s1 + $0x50] ss:$8 sps:$4 sm:$0xff]  }
  0x56   : > { %s388_s26 = scalar_select %p387_p12, %s3101_s22, 24  ;;  %v2596_v12 = vld [vmem:[%s3894_s1 + $0x64] ss:$8 sps:$4 sm:$0xff]   ;;  %v2598_v16 = vld [vmem:[%s3894_s1 + $0x60] ss:$8 sps:$4 sm:$0xff]   ;;  %v2630_v28 = vld [vmem:[#allocation2 + $0x50] sm:$0xff]  }
  0x57   : > { %664 = vmatpush1.bf16.msra.mxu0 %v2583_v3  ;;  %v2599_v17 = vld [vmem:[%s3894_s1 + $0x74] ss:$8 sps:$4 sm:$0xff]   ;;  %v2601_v18 = vld [vmem:[%s3894_s1 + $0x70] ss:$8 sps:$4 sm:$0xff]   ;;  %v2602_v19 = vld [vmem:[%s3894_s1 + $0x84] ss:$8 sps:$4 sm:$0xff]  }
  0x58   : > { %665 = vmatprep.subr.bf16.mxu0 %v2584_v4  ;;  %s2267_s14 = sshll.u32 %s388_s26, 4  ;;  %v2604_v20 = vld [vmem:[%s3894_s1 + $0x80] ss:$8 sps:$4 sm:$0xff]   ;;  %v2605_v21 = vld [vmem:[%s3894_s1 + $0x94] ss:$8 sps:$4 sm:$0xff]   ;;  %s3387_s17 = sand.u32 1, %s2864_s10  }
  0x59   : > { %s3126_s11 = scalar_lea.vmem %s3893_s0, %s2267_s14  ;;  %v2626_v22 = vld [vmem:[#allocation2 + $0x40] sm:$0xff]   ;;  %v2607_v23 = vld [vmem:[%s3894_s1 + $0x90] ss:$8 sps:$4 sm:$0xff]   ;;  %v2628_v26 = vld [vmem:[#allocation2 + $0x48] sm:$0xff]   ;;  %s2147_s15 = sshll.u32 %s3387_s17, 6 }
  0x5a   : > { %v410_v13 = vld [vmem:[%s3126_s11 + $0x8] sm:$0xff]  ;;  %v412_v14 = vld [vmem:[%s3126_s11 + $0x18] sm:$0xff]  ;;  %v2627_v24 = vld [vmem:[#allocation2] sm:$0xff]   ;;  %2335 = vmatprep.subr.bf16.mxu1 %v2626_v22  ;;  %s3407_s18 = scalar_lea.vmem [#allocation7], %s2147_s15  ;;  %s2148_s24 = sshll.u32 %s3387_s17, 7 }
  0x5b   : > { %666 = vmatpush1.bf16.msra.mxu0 %v2586_v5  ;;  %v442_v15 = vpack.c.bf16 %v412_v14, %v410_v13  ;;  %v2608_v25 = vld [vmem:[%s3894_s1 + $0xa4] ss:$8 sps:$4 sm:$0xff]   ;;  %2336 = vmatpush3.bf16.msra.mxu1 %v2627_v24  ;;  %v2610_v29 = vld [vmem:[%s3894_s1 + $0xa0] ss:$8 sps:$4 sm:$0xff]   ;;  %v2611_v30 = vld [vmem:[%s3894_s1 + $0xb4] ss:$8 sps:$4 sm:$0xff]  }
  0x5c   : > { %667 = vmatprep.subr.bf16.mxu0 %v2587_v6  ;;  %v2629_v27 = vld [vmem:[#allocation2 + $0x8] sm:$0xff]   ;;  %2337 = vmatprep.subr.bf16.mxu1 %v2628_v26  ;;  %v2631_v31 = vld [vmem:[#allocation2 + $0x10] sm:$0xff]   ;;  %v2632_v32 = vld [vmem:[#allocation2 + $0x58] sm:$0xff]   ;;  %s1782_s26 = scalar_lea.sflag [#allocation4], %s3387_s17  ;;  %p3951_p10 = scmp.ne.s32.totalorder %s3911_s19, 0 }
  0x5d   : > { %693 = vmatprep.mubr.bf16.mxu0 %v442_v15  ;;  %v2613_v33 = vld [vmem:[%s3894_s1 + $0xb0] ss:$8 sps:$4 sm:$0xff]   ;;  %v2614_v34 = vld [vmem:[%s3894_s1 + $0xc4] ss:$8 sps:$4 sm:$0xff]   ;;  %v2616_v37 = vld [vmem:[%s3894_s1 + $0xc0] ss:$8 sps:$4 sm:$0xff]  }
  0x5e   : > { %v2633_v35 = vld [vmem:[#allocation2 + $0x18] sm:$0xff]   ;;  %v2634_v36 = vld [vmem:[#allocation2 + $0x60] sm:$0xff]   ;;  %v2636_v40 = vld [vmem:[#allocation2 + $0x68] sm:$0xff]   ;;  %s1794_s27 = ssub.s32 (%p3951_p10), 25, %s3101_s22 }
  0x5f   : > { %668 = vmatpush1.bf16.msra.mxu0 %v2589_v7  ;;  %2338 = vmatpush3.bf16.msra.mxu1 %v2629_v27  ;;  %v2635_v38 = vld [vmem:[#allocation2 + $0x20] sm:$0xff]   ;;  %v2617_v39 = vld [vmem:[%s3894_s1 + $0xd4] ss:$8 sps:$4 sm:$0xff]   ;;  %v2619_v41 = vld [vmem:[%s3894_s1 + $0xd0] ss:$8 sps:$4 sm:$0xff]   ;;  %p1795_p1 = scmp.lt.s32.totalorder (%p3951_p10), %s1794_s27, 16 }
  0x60   : > { %669 = vmatprep.subr.bf16.mxu0 %v2590_v8  ;;  %2339 = vmatprep.subr.bf16.mxu1 %v2630_v28  ;;  %v2620_v42 = vld [vmem:[%s3894_s1 + $0xe4] ss:$8 sps:$4 sm:$0xff]   ;;  %v2622_v43 = vld [vmem:[%s3894_s1 + $0xe0] ss:$8 sps:$4 sm:$0xff]   ;;  %v2623_v44 = vld [vmem:[%s3894_s1 + $0xf4] ss:$8 sps:$4 sm:$0xff]  }
  0x61   : > { %v2625_v45 = vld [vmem:[%s3894_s1 + $0xf0] ss:$8 sps:$4 sm:$0xff]   ;;  %v409_v46 = vld [vmem:[%s3126_s11] sm:$0xff]  ;;  %v414_v48 = vld [vmem:[%s3126_s11 + $0x28] sm:$0xff] }
  0x62   : > { %v411_v47 = vld [vmem:[%s3126_s11 + $0x10] sm:$0xff]  ;;  %v416_v49 = vld [vmem:[%s3126_s11 + $0x38] sm:$0xff]  ;;  %v413_v52 = vld [vmem:[%s3126_s11 + $0x20] sm:$0xff] }
  0x63   : > { %670 = vmatpush1.bf16.msra.mxu0 %v2592_v9  ;;  %2340 = vmatpush3.bf16.msra.mxu1 %v2631_v31  ;;  %v441_v50 = vpack.c.bf16 %v411_v47, %v409_v46  ;;  %v444_v51 = vpack.c.bf16 %v416_v49, %v414_v48  ;;  %v415_v53 = vld [vmem:[%s3126_s11 + $0x30] sm:$0xff]  ;;  %v418_v54 = vld [vmem:[%s3126_s11 + $0x48] sm:$0xff]  ;;  %v420_v55 = vld [vmem:[%s3126_s11 + $0x58] sm:$0xff] }
  0x64   : > { %671 = vmatprep.subr.bf16.mxu0 %v2593_v10  ;;  %2341 = vmatprep.subr.bf16.mxu1 %v2632_v32  ;;  %v443_v56 = vpack.c.bf16 %v415_v53, %v413_v52  ;;  %v446_v57 = vpack.c.bf16 %v420_v55, %v418_v54  ;;  %v417_v58 = vld [vmem:[%s3126_s11 + $0x40] sm:$0xff]  ;;  %v419_v59 = vld [vmem:[%s3126_s11 + $0x50] sm:$0xff]  ;;  %v422_v60 = vld [vmem:[%s3126_s11 + $0x68] sm:$0xff] }
  0x65   : > { %v424_v61 = vld [vmem:[%s3126_s11 + $0x78] sm:$0xff]  ;;  %v445_v62 = vpack.c.bf16 %v419_v59, %v417_v58  ;;  %v421_v0 = vld [vmem:[%s3126_s11 + $0x60] sm:$0xff]  ;;  %v423_v1 = vld [vmem:[%s3126_s11 + $0x70] sm:$0xff] }
  0x66   : > { %v448_v63 = vpack.c.bf16 %v424_v61, %v422_v60  ;;  %v426_v2 = vld [vmem:[%s3126_s11 + $0x88] sm:$0xff]  ;;  %v428_v3 = vld [vmem:[%s3126_s11 + $0x98] sm:$0xff]  ;;  %v447_v4 = vpack.c.bf16 %v423_v1, %v421_v0  ;;  %v425_v6 = vld [vmem:[%s3126_s11 + $0x80] sm:$0xff] }
  0x67   : > { %672 = vmatpush1.bf16.msra.mxu0 %v2595_v11  ;;  %2342 = vmatpush3.bf16.msra.mxu1 %v2633_v35  ;;  %v450_v5 = vpack.c.bf16 %v428_v3, %v426_v2  ;;  %v427_v7 = vld [vmem:[%s3126_s11 + $0x90] sm:$0xff]  ;;  %v430_v8 = vld [vmem:[%s3126_s11 + $0xa8] sm:$0xff]  ;;  %v432_v9 = vld [vmem:[%s3126_s11 + $0xb8] sm:$0xff] }
  0x68   : > { %673 = vmatprep.subr.bf16.mxu0 %v2596_v12  ;;  %2343 = vmatprep.subr.bf16.mxu1 %v2634_v36  ;;  %v449_v10 = vpack.c.bf16 %v427_v7, %v425_v6  ;;  %v452_v11 = vpack.c.bf16 %v432_v9, %v430_v8  ;;  %v429_v12 = vld [vmem:[%s3126_s11 + $0xa0] sm:$0xff]  ;;  %v431_v13 = vld [vmem:[%s3126_s11 + $0xb0] sm:$0xff]  ;;  %v434_v14 = vld [vmem:[%s3126_s11 + $0xc8] sm:$0xff] }
  0x69   : > { %v436_v15 = vld [vmem:[%s3126_s11 + $0xd8] sm:$0xff]  ;;  %v437_v24 = vld [vmem:[%s3126_s11 + $0xe0] sm:$0xff]  ;;  %v2637_v27 = vld [vmem:[#allocation2 + $0x28] sm:$0xff]  }
  0x6a   : > { %v2638_v28 = vld [vmem:[#allocation2 + $0x70] sm:$0xff]   ;;  %v2641_v31 = vld [vmem:[#allocation2 + $0x38] sm:$0xff]   ;;  %v2642_v32 = vld [vmem:[#allocation5] sm:$0xff]  }
  0x6b   : > { %674 = vmatpush1.bf16.msra.mxu0 %v2598_v16  ;;  %2344 = vmatpush3.bf16.msra.mxu1 %v2635_v38  ;;  %v451_v16 = vpack.c.bf16 %v431_v13, %v429_v12  ;;  %v489_v36 = vld [vmem:[%s3895_s2] sm:$0x3]  ;;  %v2644_v1 = vld [vmem:[#allocation5 + $0x10] sm:$0xff]  }
  0x6c   : > { %675 = vmatprep.subr.bf16.mxu0 %v2599_v17  ;;  %2345 = vmatprep.subr.bf16.mxu1 %v2636_v40  ;;  %v454_v17 = vpack.c.bf16 %v436_v15, %v434_v14 }
  0x6f   : > { %676 = vmatpush1.bf16.msra.mxu0 %v2601_v18  ;;  %v433_v18 = vld [vmem:[%s3126_s11 + $0xc0] sm:$0xff]  ;;  %2346 = vmatpush3.bf16.msra.mxu1 %v2637_v27 }
  0x70   : > { %677 = vmatprep.subr.bf16.mxu0 %v2602_v19  ;;  %v435_v19 = vld [vmem:[%s3126_s11 + $0xd0] sm:$0xff]  ;;  %2347 = vmatprep.subr.bf16.mxu1 %v2638_v28 }
  0x71   : > { %v453_v22 = vpack.c.bf16 %v435_v19, %v433_v18 }
  0x73   : > { %678 = vmatpush1.bf16.msra.mxu0 %v2604_v20  ;;  %v438_v20 = vld [vmem:[%s3126_s11 + $0xe8] sm:$0xff] }
  0x74   : > { %679 = vmatprep.subr.bf16.mxu0 %v2605_v21  ;;  %v440_v21 = vld [vmem:[%s3126_s11 + $0xf8] sm:$0xff] }
  0x77   : > { %680 = vmatpush1.bf16.msra.mxu0 %v2607_v23  ;;  %v456_v23 = vpack.c.bf16 %v440_v21, %v438_v20 }
  0x78   : > { %681 = vmatprep.subr.bf16.mxu0 %v2608_v25  ;;  %v439_v25 = vld [vmem:[%s3126_s11 + $0xf0] sm:$0xff]  ;;  %s3659_s11 = scalar_lea.vmem [#allocation8], %s2148_s24  }
  0x79   : > { %v455_v26 = vpack.c.bf16 %v439_v25, %v437_v24 }
  0x7b   : > { %682 = vmatpush1.bf16.msra.mxu0 %v2610_v29  ;;  %v2639_v29 = vld [vmem:[#allocation2 + $0x30] sm:$0xff]  }
  0x7c   : > { %683 = vmatprep.subr.bf16.mxu0 %v2611_v30  ;;  %2348 = vmatpush3.bf16.msra.mxu1 %v2639_v29  ;;  %v2640_v30 = vld [vmem:[#allocation2 + $0x78] sm:$0xff]  }
  0x7d   : > { %2349 = vmatprep.subr.bf16.mxu1 %v2640_v30 }
  0x7f   : > { %684 = vmatpush1.bf16.msra.mxu0 %v2613_v33  ;;  %v491_v33 = vlaneseq }
  0x80   : > { %685 = vmatprep.subr.bf16.mxu0 %v2614_v34  ;;  %2350 = vmatpush3.bf16.msra.mxu1 %v2641_v31 }
  0x81   : > { %2415 = vmatprep.subr.bf16.mxu1 %v2642_v32  ;;  %v3224_v34 = vshrl.u32 %v491_v33, 7 }
  0x83   : > { %686 = vmatpush1.bf16.msra.mxu0 %v2616_v37  ;;  %v493_v35 = vsub.s32 0, %v3224_v34  ;;  %v497_v37 = vsub.s32 1, %v3224_v34 }
  0x84   : > { %687 = vmatprep.subr.bf16.mxu0 %v2617_v39 }
  0x85   : > { %v3231_v38 = vrot.slane %v489_v36, %v493_v35  ;;  %v3233_v39 = vrot.slane %v489_v36, %v497_v37 }
  0x87   : > { %688 = vmatpush1.bf16.msra.mxu0 %v2619_v41 }
  0x88   : > { %689 = vmatprep.subr.bf16.mxu0 %v2620_v42 }
  0x8b   : > { %690 = vmatpush1.bf16.msra.mxu0 %v2622_v43 }
  0x8c   : > { %691 = vmatprep.subr.bf16.mxu0 %v2623_v44 }
  0x8f   : > { %692 = vmatpush1.bf16.msra.mxu0 %v2625_v45 }
  0x92   : > { %694 = vmatmul.mubr.bf16.vlgmr.msra.gmra.mrb[0].mxu0 %v441_v50 }
  0x93   : > { %703 = vmatprep.mubr.bf16.mxu0 %v444_v51 }
  0x9a   : > { %704 = vmatmul.mubr.bf16.gmra.mrb[4].mxu0 %v443_v56 }
  0x9b   : > { %713 = vmatprep.mubr.bf16.mxu0 %v446_v57  ;;  %v2643_v57 = vld [vmem:[#allocation5 + $0x8] sm:$0xff]  }
  0xa2   : > { %714 = vmatmul.mubr.bf16.gmra.mrb[8].mxu0 %v445_v62 }
  0xa3   : > { %723 = vmatprep.mubr.bf16.mxu0 %v448_v63 }
  0xaa   : > { %724 = vmatmul.mubr.bf16.gmra.mrb[12].mxu0 %v447_v4 }
  0xab   : > { %733 = vmatprep.mubr.bf16.mxu0 %v450_v5 }
  0xb2   : > { %734 = vmatmul.mubr.bf16.gmra.mrb[16].mxu0 %v449_v10 }
  0xb3   : > { %743 = vmatprep.mubr.bf16.mxu0 %v452_v11 }
  0xba   : > { %744 = vmatmul.mubr.bf16.gmra.mrb[20].mxu0 %v451_v16 }
  0xbb   : > { %753 = vmatprep.mubr.bf16.mxu0 %v454_v17 }
  0xc2   : > { %754 = vmatmul.mubr.bf16.gmra.mrb[24].mxu0 %v453_v22 }
  0xc3   : > { %763 = vmatprep.mubr.bf16.mxu0 %v456_v23 }
  0xca   : > { %764 = vmatmul.mubr.bf16.gmra.mrb[28].mxu0 %v455_v26 }
 0x165   : > { %v695_v40 = vpop.f32.mrb[0].mxu0 }
 0x166   : > { %v696_v41 = vadd.f32 %v695_v40, %v3231_v38  ;;  %v697_v42 = vpop.f32.mrb[1].mxu0 }
 0x167   : > { %v698_v43 = vadd.f32 %v697_v42, %v3233_v39  ;;  %v699_v44 = vpop.f32.mrb[2].mxu0 }
 0x168   : > { %v700_v45 = vadd.f32 %v699_v44, %v3231_v38  ;;  %v701_v46 = vpop.f32.mrb[3].mxu0  ;;  %v774_v48 = vmax.f32 %v696_v41, 0.0 }
 0x169   : > { %v702_v47 = vadd.f32 %v701_v46, %v3233_v39  ;;  %v775_v50 = vmax.f32 %v698_v43, 0.0 }
 0x16a   : > { %v776_v49 = vmax.f32 %v700_v45, 0.0 }
 0x16b   : > { %v777_v51 = vmax.f32 %v702_v47, 0.0 }
 0x16c   : > { %v806_v52 = vpack.c.bf16 %v776_v49, %v774_v48 }
 0x16d   : > { %v705_v53 = vpop.f32.mrb[4].mxu0  ;;  %v807_v54 = vpack.c.bf16 %v777_v51, %v775_v50 }
 0x16e   : > { %v706_v55 = vadd.f32 %v705_v53, %v3231_v38  ;;  %v707_v56 = vpop.f32.mrb[5].mxu0 }
 0x16f   : > { %v708_v58 = vadd.f32 %v707_v56, %v3233_v39  ;;  %v709_v59 = vpop.f32.mrb[6].mxu0  ;;  %989 = vmatprep.mubr.bf16.mxu1 %v807_v54 }
 0x170   : > { %v710_v60 = vadd.f32 %v709_v59, %v3231_v38  ;;  %v711_v61 = vpop.f32.mrb[7].mxu0  ;;  %990 = vmatmul.mubr.bf16.vlgmr.msra.gmra.mrb[0].mxu1 %v806_v52  ;;  %v778_v63 = vmax.f32 %v706_v55, 0.0 }
 0x171   : > { %v712_v62 = vadd.f32 %v711_v61, %v3233_v39  ;;  %2416 = vmatpush3.bf16.msra.mxu1 %v2642_v32  ;;  %v779_v2 = vmax.f32 %v708_v58, 0.0 }
 0x172   : > { %v780_v0 = vmax.f32 %v710_v60, 0.0  ;;  %2417 = vmatprep.subr.bf16.mxu1 %v2643_v57 }
 0x173   : > { %v781_v3 = vmax.f32 %v712_v62, 0.0 }
 0x174   : > { %v808_v4 = vpack.c.bf16 %v780_v0, %v778_v63 }
 0x175   : > { %v809_v5 = vpack.c.bf16 %v781_v3, %v779_v2  ;;  %v715_v6 = vpop.f32.mrb[8].mxu0  ;;  %2418 = vmatpush3.bf16.msra.mxu1 %v2643_v57 }
 0x176   : > { %v716_v7 = vadd.f32 %v715_v6, %v3231_v38  ;;  %v717_v8 = vpop.f32.mrb[9].mxu0  ;;  %2419 = vmatprep.subr.bf16.mxu1 %v2644_v1 }
 0x177   : > { %v718_v9 = vadd.f32 %v717_v8, %v3233_v39  ;;  %v719_v10 = vpop.f32.mrb[10].mxu0  ;;  %997 = vmatprep.mubr.bf16.mxu1 %v809_v5 }
 0x178   : > { %v720_v11 = vadd.f32 %v719_v10, %v3231_v38  ;;  %v721_v12 = vpop.f32.mrb[11].mxu0  ;;  %998 = vmatmul.mubr.bf16.gmra.mrb[4].mxu1 %v808_v4  ;;  %v782_v14 = vmax.f32 %v716_v7, 0.0 }
 0x179   : > { %v722_v13 = vadd.f32 %v721_v12, %v3233_v39  ;;  %2420 = vmatpush3.bf16.msra.mxu1 %v2644_v1  ;;  %v783_v16 = vmax.f32 %v718_v9, 0.0 }
 0x17a   : > { %v784_v15 = vmax.f32 %v720_v11, 0.0 }
 0x17b   : > { %v785_v17 = vmax.f32 %v722_v13, 0.0 }
 0x17c   : > { %v810_v18 = vpack.c.bf16 %v784_v15, %v782_v14 }
 0x17d   : > { %v811_v19 = vpack.c.bf16 %v785_v17, %v783_v16  ;;  %v725_v20 = vpop.f32.mrb[12].mxu0 }
 0x17e   : > { %v726_v21 = vadd.f32 %v725_v20, %v3231_v38  ;;  %v727_v22 = vpop.f32.mrb[13].mxu0 }
 0x17f   : > { %v728_v23 = vadd.f32 %v727_v22, %v3233_v39  ;;  %v729_v24 = vpop.f32.mrb[14].mxu0  ;;  %1005 = vmatprep.mubr.bf16.mxu1 %v811_v19 }
 0x180   : > { %v730_v25 = vadd.f32 %v729_v24, %v3231_v38  ;;  %v731_v26 = vpop.f32.mrb[15].mxu0  ;;  %1006 = vmatmul.mubr.bf16.gmra.mrb[8].mxu1 %v810_v18  ;;  %v786_v28 = vmax.f32 %v726_v21, 0.0 }
 0x181   : > { %v732_v27 = vadd.f32 %v731_v26, %v3233_v39  ;;  %v787_v30 = vmax.f32 %v728_v23, 0.0 }
 0x182   : > { %v788_v29 = vmax.f32 %v730_v25, 0.0 }
 0x183   : > { %v789_v31 = vmax.f32 %v732_v27, 0.0 }
 0x184   : > { %v812_v32 = vpack.c.bf16 %v788_v29, %v786_v28 }
 0x185   : > { %v813_v35 = vpack.c.bf16 %v789_v31, %v787_v30  ;;  %v735_v36 = vpop.f32.mrb[16].mxu0  ;;  %v2645_v30 = vld [vmem:[#allocation5 + $0x18] sm:$0xff]   ;;  %v2646_v31 = vld [vmem:[#allocation5 + $0x20] sm:$0xff]  }
 0x186   : > { %v736_v37 = vadd.f32 %v735_v36, %v3231_v38  ;;  %v737_v40 = vpop.f32.mrb[17].mxu0  ;;  %2421 = vmatprep.subr.bf16.mxu1 %v2645_v30  ;;  %v1653_v36 = vadd.s32 16, %v3224_v34 }
 0x187   : > { %v738_v41 = vadd.f32 %v737_v40, %v3233_v39  ;;  %v739_v42 = vpop.f32.mrb[18].mxu0  ;;  %1013 = vmatprep.mubr.bf16.mxu1 %v813_v35  ;;  %2422 = vmatpush3.bf16.msra.mxu1 %v2645_v30  ;;  %v1652_v35 = vadd.s32 8, %v3224_v34  ;;  %v2910_v40 = vmov 0  }
 0x188   : > { %v740_v43 = vadd.f32 %v739_v42, %v3231_v38  ;;  %v741_v44 = vpop.f32.mrb[19].mxu0  ;;  %1014 = vmatmul.mubr.bf16.gmra.mrb[12].mxu1 %v812_v32  ;;  %v790_v46 = vmax.f32 %v736_v37, 0.0  ;;  %2423 = vmatprep.subr.bf16.mxu1 %v2646_v31  ;;  %v2648_v32 = vld [vmem:[#allocation5 + $0x30] sm:$0xff]   ;;  %v1654_v37 = vadd.s32 24, %v3224_v34  ;;  %v1655_v42 = vadd.s32 32, %v3224_v34 }
 0x189   : > { %v742_v45 = vadd.f32 %v741_v44, %v3233_v39  ;;  %v791_v48 = vmax.f32 %v738_v41, 0.0  ;;  %2577 = vset.pattern.permute.xlu1 %v2910_v40  ;;  %v3280_v41 = vstv %s3268_s21  ;;  %2576 = vset.pattern.permute.xlu0 %v2910_v40  ;;  %v1657_v44 = vadd.s32 48, %v3224_v34 }
 0x18a   : > { %v792_v47 = vmax.f32 %v740_v43, 0.0  ;;  %v1656_v43 = vadd.s32 40, %v3224_v34 }
 0x18b   : > { %v793_v49 = vmax.f32 %v742_v45, 0.0  ;;  %2424 = vmatpush3.bf16.msra.mxu1 %v2646_v31  ;;  %v1329_v45 = vld [vmem:[%s3277_s29 + $0x8] sm:$0xff] }
 0x18c   : > { %v814_v50 = vpack.c.bf16 %v792_v47, %v790_v46  ;;  %v1669_v46 = vadd.s32 %v3280_v41, %v1652_v35  ;;  %v1330_v47 = vld [vmem:[%s3277_s29 + $0x10] sm:$0xff]  ;;  %1510 = vperm.xlu1 %2577, %v1329_v45   ;;  %vm1701_vm0 = vcmp.ge.s32.totalorder %v1329_v45, 0 }
 0x18d   : > { %v815_v51 = vpack.c.bf16 %v793_v49, %v791_v48  ;;  %v745_v52 = vpop.f32.mrb[20].mxu0  ;;  %v1670_v48 = vadd.s32 %v3280_v41, %v1653_v36  ;;  %v1328_v49 = vld [vmem:[%s3277_s29] sm:$0xff]  ;;  %vm1702_vm1 = vcmp.ge.s32.totalorder %v1330_v47, 0 }
 0x18e   : > { %v746_v53 = vadd.f32 %v745_v52, %v3231_v38  ;;  %v747_v54 = vpop.f32.mrb[21].mxu0  ;;  %1507 = vperm.xlu0 %2576, %v1328_v49   ;;  %v1672_v52 = vadd.s32 %v3280_v41, %v1655_v42  ;;  %vm1685_vm2 = vcmp.lt.s32.totalorder %v1669_v46, 200  ;;  %vm1700_vm5 = vcmp.ge.s32.totalorder %v1328_v49, 0 }
 0x18f   : > { %v748_v55 = vadd.f32 %v747_v54, %v3233_v39  ;;  %v749_v56 = vpop.f32.mrb[22].mxu0  ;;  %1021 = vmatprep.mubr.bf16.mxu1 %v815_v51  ;;  %v1671_v51 = vadd.s32 %v3280_v41, %v1654_v37  ;;  %vm1686_vm3 = vcmp.lt.s32.totalorder %v1670_v48, 200  ;;  %vm3295_vm6 = vmand %vm1685_vm2, %vm1701_vm0 }
 0x190   : > { %v750_v57 = vadd.f32 %v749_v56, %v3231_v38  ;;  %v751_v58 = vpop.f32.mrb[23].mxu0  ;;  %1022 = vmatmul.mubr.bf16.gmra.mrb[16].mxu1 %v814_v50  ;;  %v794_v60 = vmax.f32 %v746_v53, 0.0  ;;  %v1668_v50 = vadd.s32 %v3280_v41, %v3224_v34  ;;  %v1331_v53 = vld [vmem:[%s3277_s29 + $0x18] sm:$0xff]  ;;  %v1673_v56 = vadd.s32 %v3280_v41, %v1656_v43  ;;  %vm3304_vm9 = vmand %vm1686_vm3, %vm1702_vm1  ;;  %1513 = vperm.xlu1 %2577, %v1330_v47  }
 0x191   : > { %v752_v59 = vadd.f32 %v751_v58, %v3233_v39  ;;  %v795_v62 = vmax.f32 %v748_v55, 0.0  ;;  %vm1687_vm7 = vcmp.lt.s32.totalorder %v1671_v51, 200  ;;  %vm1703_vm8 = vcmp.ge.s32.totalorder %v1331_v53, 0  ;;  %v1332_v55 = vld [vmem:[%s3277_s29 + $0x20] sm:$0xff] }
 0x192   : > { %v796_v61 = vmax.f32 %v750_v57, 0.0  ;;  %vm1684_vm4 = vcmp.lt.s32.totalorder %v1668_v50, 200  ;;  %v3302_v57 = vld [vmem:[%s3277_s29 + $0x48] sm:$0xff]  ;;  %vm1688_vm10 = vcmp.lt.s32.totalorder %v1672_v52, 200  ;;  %vm1704_vm11 = vcmp.ge.s32.totalorder %v1332_v55, 0  ;;  %vm3321_vm15 = vmand %vm1687_vm7, %vm1703_vm8 }
 0x193   : > { %v797_v63 = vmax.f32 %v752_v59, 0.0  ;;  %v1333_v59 = vld [vmem:[%s3277_s29 + $0x28] sm:$0xff]  ;;  %vm3313_vm12 = vmand %vm1684_vm4, %vm1700_vm5  ;;  %vm1689_vm13 = vcmp.lt.s32.totalorder %v1673_v56, 200  ;;  %1534 = vperm.xlu0 %2576, %v3302_v57  }
 0x194   : > { %v816_v0 = vpack.c.bf16 %v796_v61, %v794_v60  ;;  %v1674_v60 = vadd.s32 %v3280_v41, %v1657_v44  ;;  %v1658_v61 = vadd.s32 56, %v3224_v34  ;;  %vm1705_vm14 = vcmp.ge.s32.totalorder %v1333_v59, 0  ;;  %vm3332_vm2 = vmand %vm1688_vm10, %vm1704_vm11  ;;  %1516 = vperm.xlu1 %2577, %v1331_v53  }
 0x195   : > { %v817_v1 = vpack.c.bf16 %v797_v63, %v795_v62  ;;  %v755_v2 = vpop.f32.mrb[24].mxu0  ;;  %v1334_v63 = vld [vmem:[%s3277_s29 + $0x30] sm:$0xff]  ;;  %vm3336_vm4 = vmand %vm1689_vm13, %vm1705_vm14 }
 0x196   : > { %v756_v3 = vadd.f32 %v755_v2, %v3231_v38  ;;  %v757_v4 = vpop.f32.mrb[25].mxu0  ;;  %vm1690_vm0 = vcmp.lt.s32.totalorder %v1674_v60, 200  ;;  %vm1706_vm1 = vcmp.ge.s32.totalorder %v1334_v63, 0  ;;  %v1675_v2 = vadd.s32 %v3280_v41, %v1658_v61 }
 0x197   : > { %v758_v5 = vadd.f32 %v757_v4, %v3233_v39  ;;  %v759_v6 = vpop.f32.mrb[26].mxu0  ;;  %1029 = vmatprep.mubr.bf16.mxu1 %v817_v1  ;;  %v1335_v1 = vld [vmem:[%s3277_s29 + $0x38] sm:$0xff]  ;;  %vm3340_vm7 = vmand %vm1690_vm0, %vm1706_vm1 }
 0x198   : > { %v760_v7 = vadd.f32 %v759_v6, %v3231_v38  ;;  %v761_v8 = vpop.f32.mrb[27].mxu0  ;;  %1030 = vmatmul.mubr.bf16.gmra.mrb[20].mxu1 %v816_v0  ;;  %v798_v10 = vmax.f32 %v756_v3, 0.0  ;;  %v3328_v3 = vld [vmem:[%s3277_s29 + $0x58] sm:$0xff]  ;;  %vm1707_vm3 = vcmp.ge.s32.totalorder %v1335_v1, 0  ;;  %vm1691_vm5 = vcmp.lt.s32.totalorder %v1675_v2, 200  ;;  %1519 = vperm.xlu1 %2577, %v1332_v55  }
 0x199   : > { %v762_v9 = vadd.f32 %v761_v8, %v3233_v39  ;;  %v799_v12 = vmax.f32 %v758_v5, 0.0  ;;  %v3930_v5 = vmov 0  ;;  %1540 = vperm.xlu0 %2576, %v3328_v3   ;;  %vm3345_vm8 = vmand %vm1691_vm5, %vm1707_vm3  ;;  %v3350_v8 = vld [vmem:[%s3277_s29 + $0x68] sm:$0xff] }
 0x19a   : > { %v800_v11 = vmax.f32 %v760_v7, 0.0  ;;  %v3931_v5 = vsel %vm3336_vm4, 4294967295, %v3930_v5 }
 0x19b   : > { %v801_v13 = vmax.f32 %v762_v9, 0.0  ;;  %v3354_v9 = vld [vmem:[%s3277_s29 + $0x40] sm:$0xff] }
 0x19c   : > { %v818_v14 = vpack.c.bf16 %v800_v11, %v798_v10  ;;  %1522 = vperm.xlu1 %2577, %v1333_v59   ;;  %v3358_v10 = vld [vmem:[%s3277_s29 + $0x50] sm:$0xff]  ;;  %v3362_v11 = vld [vmem:[%s3277_s29 + $0x60] sm:$0xff] }
 0x19d   : > { %v819_v15 = vpack.c.bf16 %v801_v13, %v799_v12  ;;  %v765_v16 = vpop.f32.mrb[28].mxu0  ;;  %1546 = vperm.xlu0 %2576, %v3350_v8   ;;  %v3368_v13 = vld [vmem:[%s3897_s4] ss:$0 sm:$0xff] }
 0x19e   : > { %v766_v17 = vadd.f32 %v765_v16, %v3231_v38  ;;  %v767_v18 = vpop.f32.mrb[29].mxu0 }
 0x19f   : > { %v768_v19 = vadd.f32 %v767_v18, %v3233_v39  ;;  %v769_v20 = vpop.f32.mrb[30].mxu0  ;;  %1037 = vmatprep.mubr.bf16.mxu1 %v819_v15 }
 0x1a0   : > { %v770_v21 = vadd.f32 %v769_v20, %v3231_v38  ;;  %v771_v22 = vpop.f32.mrb[31].mxu0  ;;  %1038 = vmatmul.mubr.bf16.gmra.mrb[24].mxu1 %v818_v14  ;;  %v802_v24 = vmax.f32 %v766_v17, 0.0  ;;  %v2647_v38 = vld [vmem:[#allocation5 + $0x28] sm:$0xff]   ;;  %1525 = vperm.xlu1 %2577, %v1334_v63  }
 0x1a1   : > { %v772_v23 = vadd.f32 %v771_v22, %v3233_v39  ;;  %v803_v26 = vmax.f32 %v768_v19, 0.0  ;;  %2425 = vmatprep.subr.bf16.mxu1 %v2647_v38  ;;  %v2649_v39 = vld [vmem:[#allocation5 + $0x38] sm:$0xff]  }
 0x1a2   : > { %v804_v25 = vmax.f32 %v770_v21, 0.0  ;;  %2426 = vmatpush3.bf16.msra.mxu1 %v2647_v38 }
 0x1a3   : > { %v805_v27 = vmax.f32 %v772_v23, 0.0  ;;  %2427 = vmatprep.subr.bf16.mxu1 %v2648_v32 }
 0x1a4   : > { %v820_v28 = vpack.c.bf16 %v804_v25, %v802_v24  ;;  %1528 = vperm.xlu1 %2577, %v1335_v1  }
 0x1a5   : > { %v821_v29 = vpack.c.bf16 %v805_v27, %v803_v26 }
 0x1a6   : > { %2428 = vmatpush3.bf16.msra.mxu1 %v2648_v32 }
 0x1a7   : > { %1045 = vmatprep.mubr.bf16.mxu1 %v821_v29  ;;  %2429 = vmatprep.subr.bf16.mxu1 %v2649_v39 }
 0x1a8   : > { %1046 = vmatmul.mubr.bf16.gmra.mrb[28].mxu1 %v820_v28  ;;  %1531 = vperm.xlu1 %2577, %v3354_v9  }
 0x1aa   : > { %2430 = vmatpush3.bf16.msra.mxu1 %v2649_v39 }
 0x1ac   : > { %1537 = vperm.xlu1 %2577, %v3358_v10  }
 0x1b0   : > { %1543 = vperm.xlu1 %2577, %v3362_v11  }
 0x243   : > { %v2351_v12 = vpop.f32.mrb[0].mxu1 }
 0x244   : > { %v2352_v14 = vpop.f32.mrb[1].mxu1 }
 0x245   : > { %v2353_v15 = vadd.f32 %v2352_v14, %v2351_v12  ;;  %v2354_v16 = vpop.f32.mrb[2].mxu1 }
 0x246   : > { %v2355_v17 = vpop.f32.mrb[3].mxu1 }
 0x247   : > { %v992_v18 = vadd.f32 %v2353_v15, %v3368_v13  ;;  %v2356_v19 = vadd.f32 %v2355_v17, %v2354_v16 }
 0x249   : > { %v995_v20 = vadd.f32 %v2356_v19, %v3368_v13  ;;  %v1054_v21 = vmax.f32 %v992_v18, 0.0 }
 0x24b   : > { %v1055_v22 = vmax.f32 %v995_v20, 0.0  ;;  %v2357_v23 = vpop.f32.mrb[4].mxu1 }
 0x24c   : > { %v2358_v24 = vpop.f32.mrb[5].mxu1 }
 0x24d   : > { %v2359_v25 = vadd.f32 %v2358_v24, %v2357_v23  ;;  %v2360_v26 = vpop.f32.mrb[6].mxu1  ;;  %v1070_v27 = vpack.c.bf16 %v1055_v22, %v1054_v21 }
 0x24e   : > { %v2361_v28 = vpop.f32.mrb[7].mxu1 }
 0x24f   : > { %v1000_v29 = vadd.f32 %v2359_v25, %v3368_v13  ;;  %v2362_v30 = vadd.f32 %v2361_v28, %v2360_v26  ;;  %2431 = vmatprep.mubr.bf16.mxu1 %v1070_v27 }
 0x251   : > { %v1003_v31 = vadd.f32 %v2362_v30, %v3368_v13  ;;  %v1056_v38 = vmax.f32 %v1000_v29, 0.0 }
 0x253   : > { %v1057_v32 = vmax.f32 %v1003_v31, 0.0  ;;  %v2363_v39 = vpop.f32.mrb[8].mxu1 }
 0x254   : > { %v2364_v35 = vpop.f32.mrb[9].mxu1 }
 0x255   : > { %v1071_v36 = vpack.c.bf16 %v1057_v32, %v1056_v38  ;;  %v2365_v37 = vadd.f32 %v2364_v35, %v2363_v39  ;;  %v2366_v40 = vpop.f32.mrb[10].mxu1 }
 0x256   : > { %v2367_v42 = vpop.f32.mrb[11].mxu1 }
 0x257   : > { %v1008_v43 = vadd.f32 %v2365_v37, %v3368_v13  ;;  %v2368_v44 = vadd.f32 %v2367_v42, %v2366_v40  ;;  %2432 = vmatmul.mubr.bf16.vlgmr.msra.gmra.mrb[32].mxu1 %v1071_v36 }
 0x259   : > { %v1011_v45 = vadd.f32 %v2368_v44, %v3368_v13  ;;  %v1058_v46 = vmax.f32 %v1008_v43, 0.0 }
 0x25b   : > { %v1059_v47 = vmax.f32 %v1011_v45, 0.0  ;;  %v2369_v48 = vpop.f32.mrb[12].mxu1 }
 0x25c   : > { %v2370_v49 = vpop.f32.mrb[13].mxu1 }
 0x25d   : > { %v2371_v50 = vadd.f32 %v2370_v49, %v2369_v48  ;;  %v2372_v51 = vpop.f32.mrb[14].mxu1  ;;  %v1072_v52 = vpack.c.bf16 %v1059_v47, %v1058_v46 }
 0x25e   : > { %v2373_v53 = vpop.f32.mrb[15].mxu1 }
 0x25f   : > { %v1016_v55 = vadd.f32 %v2371_v50, %v3368_v13  ;;  %v2374_v56 = vadd.f32 %v2373_v53, %v2372_v51  ;;  %2435 = vmatprep.mubr.bf16.mxu1 %v1072_v52 }
 0x261   : > { %v1019_v59 = vadd.f32 %v2374_v56, %v3368_v13  ;;  %v1060_v60 = vmax.f32 %v1016_v55, 0.0 }
 0x263   : > { %v1061_v61 = vmax.f32 %v1019_v59, 0.0  ;;  %v2375_v63 = vpop.f32.mrb[16].mxu1 }
 0x264   : > { %v2376_v1 = vpop.f32.mrb[17].mxu1 }
 0x265   : > { %v2377_v2 = vadd.f32 %v2376_v1, %v2375_v63  ;;  %v2378_v12 = vpop.f32.mrb[18].mxu1  ;;  %v1073_v14 = vpack.c.bf16 %v1061_v61, %v1060_v60  ;;  %v2201_v61 = vld [vmem:[%s3899_s6] ss:$0 sm:$0xff] }
 0x266   : > { %v2379_v15 = vpop.f32.mrb[19].mxu1 }
 0x267   : > { %v1024_v16 = vadd.f32 %v2377_v2, %v3368_v13  ;;  %v2380_v17 = vadd.f32 %v2379_v15, %v2378_v12  ;;  %2436 = vmatmul.mubr.bf16.gmra.mrb[36].mxu1 %v1073_v14 }
 0x269   : > { %v1027_v18 = vadd.f32 %v2380_v17, %v3368_v13  ;;  %v1062_v19 = vmax.f32 %v1024_v16, 0.0 }
 0x26b   : > { %v1063_v20 = vmax.f32 %v1027_v18, 0.0  ;;  %v2381_v21 = vpop.f32.mrb[20].mxu1 }
 0x26c   : > { %v2382_v22 = vpop.f32.mrb[21].mxu1 }
 0x26d   : > { %v2383_v23 = vadd.f32 %v2382_v22, %v2381_v21  ;;  %v2384_v24 = vpop.f32.mrb[22].mxu1  ;;  %v1074_v25 = vpack.c.bf16 %v1063_v20, %v1062_v19 }
 0x26e   : > { %v2385_v26 = vpop.f32.mrb[23].mxu1 }
 0x26f   : > { %v1032_v27 = vadd.f32 %v2383_v23, %v3368_v13  ;;  %v2386_v28 = vadd.f32 %v2385_v26, %v2384_v24  ;;  %2439 = vmatprep.mubr.bf16.mxu1 %v1074_v25 }
 0x271   : > { %v1035_v29 = vadd.f32 %v2386_v28, %v3368_v13  ;;  %v1064_v30 = vmax.f32 %v1032_v27, 0.0 }
 0x273   : > { %v1065_v31 = vmax.f32 %v1035_v29, 0.0  ;;  %v2387_v38 = vpop.f32.mrb[24].mxu1 }
 0x274   : > { %v2388_v32 = vpop.f32.mrb[25].mxu1 }
 0x275   : > { %v2389_v39 = vadd.f32 %v2388_v32, %v2387_v38  ;;  %v2390_v35 = vpop.f32.mrb[26].mxu1  ;;  %v1075_v36 = vpack.c.bf16 %v1065_v31, %v1064_v30 }
 0x276   : > { %v2391_v37 = vpop.f32.mrb[27].mxu1 }
 0x277   : > { %v1040_v40 = vadd.f32 %v2389_v39, %v3368_v13  ;;  %v2392_v42 = vadd.f32 %v2391_v37, %v2390_v35  ;;  %2440 = vmatmul.mubr.bf16.gmra.mrb[40].mxu1 %v1075_v36 }
 0x279   : > { %v1043_v43 = vadd.f32 %v2392_v42, %v3368_v13  ;;  %v1066_v44 = vmax.f32 %v1040_v40, 0.0 }
 0x27b   : > { %v1067_v45 = vmax.f32 %v1043_v43, 0.0  ;;  %v2393_v46 = vpop.f32.mrb[28].mxu1 }
 0x27c   : > { %v2394_v47 = vpop.f32.mrb[29].mxu1 }
 0x27d   : > { %v2395_v48 = vadd.f32 %v2394_v47, %v2393_v46  ;;  %v2396_v49 = vpop.f32.mrb[30].mxu1  ;;  %v1076_v50 = vpack.c.bf16 %v1067_v45, %v1066_v44 }
 0x27e   : > { %v2397_v51 = vpop.f32.mrb[31].mxu1 }
 0x27f   : > { %v1048_v52 = vadd.f32 %v2395_v48, %v3368_v13  ;;  %v2398_v53 = vadd.f32 %v2397_v51, %v2396_v49  ;;  %2443 = vmatprep.mubr.bf16.mxu1 %v1076_v50 }
 0x281   : > { %v1051_v55 = vadd.f32 %v2398_v53, %v3368_v13  ;;  %v1068_v56 = vmax.f32 %v1048_v52, 0.0  ;;  %v3468_v52 = vld [vmem:[%s3277_s29 + $0x70] sm:$0xff]  ;;  %v3472_v53 = vld [vmem:[%s3277_s29 + $0x78] sm:$0xff] }
 0x283   : > { %v1069_v59 = vmax.f32 %v1051_v55, 0.0  ;;  %v1511_v55 = vpop.permute.xlu1 %1510 }
 0x285   : > { %v1077_v60 = vpack.c.bf16 %v1069_v59, %v1068_v56 }
 0x287   : > { %2444 = vmatmul.mubr.bf16.gmra.mrb[44].mxu1 %v1077_v60  ;;  %v1514_v56 = vpop.permute.xlu1 %1513 }
 0x28b   : > { %v1517_v59 = vpop.permute.xlu1 %1516 }
 0x28f   : > { %v1520_v60 = vpop.permute.xlu1 %1519 }
 0x32a   : > { %v2433_v63 = vpop.f32.mrb[32].mxu1 }
 0x32b   : > { %v3392_v1 = vadd.f32 %v2433_v63, %v2201_v61  ;;  %v1183_v2 = vpop.f32.mrb[33].mxu1  ;;  %v1508_v63 = vpop.permute.xlu0 %1507 }
 0x32c   : > { %v3395_v12 = vadd.f32 %v2201_v61, %v1183_v2  ;;  %v2434_v14 = vpop.f32.mrb[34].mxu1  ;;  %v1523_v2 = vpop.permute.xlu1 %1522 }
 0x32d   : > { %v3397_v13 = vadd.f32 %v2434_v14, %v2201_v61  ;;  %1348 = vmax.xlane.f32.xlu1 %v3392_v1  ;;  %v1186_v15 = vpop.f32.mrb[35].mxu1  ;;  %v2911_v14 = vmov 0.0  }
 0x32e   : > { %v3400_v16 = vadd.f32 %v2201_v61, %v1186_v15  ;;  %1344 = vmax.xlane.f32.xlu0 %v3395_v12 }
 0x32f   : > { %v2296_v17 = vpack.c.bf16 %v3397_v13, %v3392_v1 }
 0x330   : > { %v2291_v18 = vpack.c.bf16 %v3400_v16, %v3395_v12 }
 0x331   : > { %2328 = vst [vmem:[%s3407_s18 + $0x8] sm:$0xff] %v2296_v17   ;;  %1350 = vmax.xlane.f32.xlu1 %v3397_v13 }
 0x332   : > { %2292 = vst [vmem:[%s3407_s18] sm:$0xff] %v2291_v18   ;;  %1346 = vmax.xlane.f32.xlu0 %v3400_v16  ;;  %v1526_v18 = vpop.permute.xlu1 %1525 }
 0x33a   : > { %v2437_v19 = vpop.f32.mrb[36].mxu1 }
 0x33b   : > { %v3413_v20 = vadd.f32 %v2437_v19, %v2201_v61  ;;  %v1199_v21 = vpop.f32.mrb[37].mxu1 }
 0x33c   : > { %v2438_v22 = vpop.f32.mrb[38].mxu1  ;;  %v3418_v25 = vadd.f32 %v2201_v61, %v1199_v21 }
 0x33d   : > { %v3415_v23 = vadd.f32 %v2438_v22, %v2201_v61  ;;  %v1202_v24 = vpop.f32.mrb[39].mxu1  ;;  %1356 = vmax.xlane.f32.xlu0 %v3413_v20 }
 0x33e   : > { %v3420_v26 = vadd.f32 %v2201_v61, %v1202_v24 }
 0x33f   : > { %v2306_v27 = vpack.c.bf16 %v3415_v23, %v3413_v20  ;;  %1358 = vmax.xlane.f32.xlu1 %v3415_v23 }
 0x340   : > { %v2301_v28 = vpack.c.bf16 %v3420_v26, %v3418_v25 }
 0x341   : > { %2330 = vst [vmem:[%s3407_s18 + $0x18] sm:$0xff] %v2306_v27   ;;  %1352 = vmax.xlane.f32.xlu0 %v3418_v25 }
 0x342   : > { %2329 = vst [vmem:[%s3407_s18 + $0x10] sm:$0xff] %v2301_v28   ;;  %v1529_v28 = vpop.permute.xlu1 %1528 }
 0x343   : > { %1354 = vmax.xlane.f32.xlu1 %v3420_v26 }
 0x34a   : > { %v2441_v29 = vpop.f32.mrb[40].mxu1 }
 0x34b   : > { %v3431_v30 = vadd.f32 %v2441_v29, %v2201_v61  ;;  %v1215_v31 = vpop.f32.mrb[41].mxu1 }
 0x34c   : > { %v2442_v38 = vpop.f32.mrb[42].mxu1  ;;  %v3436_v35 = vadd.f32 %v2201_v61, %v1215_v31 }
 0x34d   : > { %v3433_v32 = vadd.f32 %v2442_v38, %v2201_v61  ;;  %v1218_v39 = vpop.f32.mrb[43].mxu1  ;;  %1364 = vmax.xlane.f32.xlu0 %v3431_v30 }
 0x34e   : > { %v3438_v36 = vadd.f32 %v2201_v61, %v1218_v39 }
 0x34f   : > { %v2316_v37 = vpack.c.bf16 %v3433_v32, %v3431_v30  ;;  %1366 = vmax.xlane.f32.xlu1 %v3433_v32 }
 0x350   : > { %v2311_v40 = vpack.c.bf16 %v3438_v36, %v3436_v35 }
 0x351   : > { %2332 = vst [vmem:[%s3407_s18 + $0x28] sm:$0xff] %v2316_v37   ;;  %1360 = vmax.xlane.f32.xlu0 %v3436_v35 }
 0x352   : > { %2331 = vst [vmem:[%s3407_s18 + $0x20] sm:$0xff] %v2311_v40  }
 0x353   : > { %1362 = vmax.xlane.f32.xlu1 %v3438_v36 }
 0x35a   : > { %v2445_v42 = vpop.f32.mrb[44].mxu1 }
 0x35b   : > { %v3449_v43 = vadd.f32 %v2445_v42, %v2201_v61  ;;  %v1231_v44 = vpop.f32.mrb[45].mxu1 }
 0x35c   : > { %v2446_v45 = vpop.f32.mrb[46].mxu1  ;;  %v3454_v48 = vadd.f32 %v2201_v61, %v1231_v44 }
 0x35d   : > { %v3451_v46 = vadd.f32 %v2446_v45, %v2201_v61  ;;  %v1234_v47 = vpop.f32.mrb[47].mxu1  ;;  %1372 = vmax.xlane.f32.xlu0 %v3449_v43  ;;  %v3502_v45 = vpop.permute.xlu1 %1531 }
 0x35e   : > { %v3456_v49 = vadd.f32 %v2201_v61, %v1234_v47  ;;  %v3476_v61 = vand.u32 127, %v491_v33  ;;  %v3504_v47 = vpop.permute.xlu0 %1534 }
 0x35f   : > { %v2326_v50 = vpack.c.bf16 %v3451_v46, %v3449_v43  ;;  %1374 = vmax.xlane.f32.xlu1 %v3451_v46 }
 0x360   : > { %v2321_v51 = vpack.c.bf16 %v3456_v49, %v3454_v48  ;;  %vm1554_vm10 = vcmp.eq.s32.totalorder %v3476_v61, %v1508_v63  ;;  %vm1555_vm11 = vcmp.eq.s32.totalorder %v3476_v61, %v1511_v55  ;;  %vm1556_vm13 = vcmp.eq.s32.totalorder %v3476_v61, %v1514_v56 }
 0x361   : > { %2334 = vst [vmem:[%s3407_s18 + $0x38] sm:$0xff] %v2326_v50   ;;  %1368 = vmax.xlane.f32.xlu0 %v3454_v48  ;;  %v2227_v15 = vsel %vm1554_vm10, 1.0, %v2911_v14  ;;  %v2228_v17 = vsel %vm1555_vm11, 1.0, %v2911_v14  ;;  %vm1557_vm14 = vcmp.eq.s32.totalorder %v3476_v61, %v1517_v59  ;;  %v2229_v33 = vsel %vm1556_vm13, 1.0, %v2911_v14  ;;  %v3506_v50 = vpop.permute.xlu1 %1537 }
 0x362   : > { %2333 = vst [vmem:[%s3407_s18 + $0x30] sm:$0xff] %v2321_v51   ;;  %v1602_v19 = vmul.f32 %v2227_v15, %v3395_v12  ;;  %vm1558_vm0 = vcmp.eq.s32.totalorder %v3476_v61, %v1520_v60  ;;  %v1603_v21 = vmul.f32 %v2228_v17, %v3400_v16  ;;  %v2230_v22 = vsel %vm1557_vm14, 1.0, %v2911_v14  ;;  %v3508_v51 = vpop.permute.xlu0 %1540 }
 0x363   : > { %1370 = vmax.xlane.f32.xlu1 %v3456_v49  ;;  %vm1559_vm1 = vcmp.eq.s32.totalorder %v3476_v61, %v1523_v2  ;;  %v1604_v24 = vmul.f32 %v2229_v33, %v3392_v1  ;;  %v2231_v27 = vsel %vm1558_vm0, 1.0, %v2911_v14  ;;  %vm1560_vm3 = vcmp.eq.s32.totalorder %v3476_v61, %v1526_v18 }
 0x364   : > { %v1605_v29 = vmul.f32 %v2230_v22, %v3397_v13  ;;  %v2232_v31 = vsel %vm1559_vm1, 1.0, %v2911_v14  ;;  %vm1561_vm5 = vcmp.eq.s32.totalorder %v3476_v61, %v1529_v28  ;;  %v1606_v38 = vmul.f32 %v2231_v27, %v3418_v25 }
 0x365   : > { %v2233_v39 = vsel %vm1560_vm3, 1.0, %v2911_v14  ;;  %v1607_v37 = vmul.f32 %v2232_v31, %v3420_v26  ;;  %v2234_v40 = vsel %vm1561_vm5, 1.0, %v2911_v14  ;;  %v3510_v55 = vpop.permute.xlu1 %1543  ;;  %vm1562_vm10 = vcmp.eq.s32.totalorder %v3476_v61, %v3502_v45 }
 0x366   : > { %v1608_v42 = vmul.f32 %v2233_v39, %v3413_v20  ;;  %v1609_v44 = vmul.f32 %v2234_v40, %v3415_v23  ;;  %v3512_v56 = vpop.permute.xlu0 %1546  ;;  %vm1563_vm11 = vcmp.eq.s32.totalorder %v3476_v61, %v3504_v47  ;;  %vm1564_vm13 = vcmp.eq.s32.totalorder %v3476_v61, %v3506_v50 }
 0x367   : > { %vm1565_vm14 = vcmp.eq.s32.totalorder %v3476_v61, %v3508_v51  ;;  %vm1566_vm0 = vcmp.eq.s32.totalorder %v3476_v61, %v3510_v55  ;;  %vm1567_vm1 = vcmp.eq.s32.totalorder %v3476_v61, %v3512_v56 }
 0x368   : > { %v2238_v50 = vsel %vm1565_vm14, 1.0, %v2911_v14 }
 0x369   : > { %v1613_v55 = vmul.f32 %v2238_v50, %v3433_v32 }
 0x374   : > { %1549 = vperm.xlu1 %2577, %v3468_v52  }
 0x377   : > { %1552 = vperm.xlu0 %2576, %v3472_v53  }
 0x396   : > { %1618 = vadd.xlane.f32.xlu0 %v1602_v19 }
 0x398   : > { %1620 = vadd.xlane.f32.xlu1 %v1603_v21 }
 0x39a   : > { %1622 = vadd.xlane.f32.xlu0 %v1604_v24 }
 0x39c   : > { %1624 = vadd.xlane.f32.xlu1 %v1605_v29 }
 0x39e   : > { %1626 = vadd.xlane.f32.xlu0 %v1606_v38 }
 0x3a0   : > { %1628 = vadd.xlane.f32.xlu1 %v1607_v37 }
 0x3a2   : > { %1630 = vadd.xlane.f32.xlu0 %v1608_v42 }
 0x3a4   : > { %1632 = vadd.xlane.f32.xlu1 %v1609_v44 }
 0x3ba   : > { %v3514_v59 = vpop.xlane.xlu1 %1348 }
 0x3bb   : > { %v1378_v60 = vsub.f32 %v3392_v1, %v3514_v59  ;;  %v3518_v63 = vpop.xlane.xlu0 %1344 }
 0x3bc   : > { %v1376_v2 = vsub.f32 %v3395_v12, %v3518_v63 }
 0x3bd   : > { %v1396_v15 = vmul.f32 1.442695, %v1378_v60 }
 0x3be   : > { %v1392_v17 = vmul.f32 1.442695, %v1376_v2  ;;  %v3522_v18 = vpop.xlane.xlu1 %1350 }
 0x3bf   : > { %2650 = vpow2.f32 %v1396_v15  ;;  %v1379_v19 = vsub.f32 %v3397_v13, %v3522_v18  ;;  %v3526_v33 = vpop.xlane.xlu0 %1346 }
 0x3c0   : > { %v1377_v21 = vsub.f32 %v3400_v16, %v3526_v33  ;;  %2652 = vpow2.f32 %v1392_v17 }
 0x3c1   : > { %v1398_v22 = vmul.f32 1.442695, %v1379_v19 }
 0x3c2   : > { %v1394_v1 = vmul.f32 1.442695, %v1377_v21 }
 0x3c3   : > { %2654 = vpow2.f32 %v1398_v22 }
 0x3c4   : > { %2656 = vpow2.f32 %v1394_v1 }
 0x3c9   : > { %v2651_v24 = vpop.eup %2650 }
 0x3ca   : > { %v3530_v12 = vpop.xlane.xlu0 %1356  ;;  %1428 = vadd.xlane.f32.xlu0 %v2651_v24  ;;  %v2653_v28 = vpop.eup %2652 }
 0x3cb   : > { %v1382_v27 = vsub.f32 %v3413_v20, %v3530_v12 }
 0x3cc   : > { %v3534_v29 = vpop.xlane.xlu1 %1358 }
 0x3cd   : > { %v2655_v13 = vpop.eup %2654  ;;  %v1404_v31 = vmul.f32 1.442695, %v1382_v27  ;;  %v1383_v16 = vsub.f32 %v3415_v23, %v3534_v29 }
 0x3ce   : > { %1430 = vadd.xlane.f32.xlu1 %v2655_v13  ;;  %v3538_v38 = vpop.xlane.xlu0 %1352  ;;  %1424 = vadd.xlane.f32.xlu0 %v2653_v28  ;;  %v2657_v20 = vpop.eup %2656 }
 0x3cf   : > { %2658 = vpow2.f32 %v1404_v31  ;;  %v1406_v39 = vmul.f32 1.442695, %v1383_v16  ;;  %v1380_v37 = vsub.f32 %v3418_v25, %v3538_v38 }
 0x3d0   : > { %v3542_v40 = vpop.xlane.xlu1 %1354 }
 0x3d1   : > { %2660 = vpow2.f32 %v1406_v39  ;;  %v1400_v42 = vmul.f32 1.442695, %v1380_v37  ;;  %v1381_v44 = vsub.f32 %v3420_v26, %v3542_v40 }
 0x3d2   : > { %1426 = vadd.xlane.f32.xlu1 %v2657_v20 }
 0x3d3   : > { %2662 = vpow2.f32 %v1400_v42  ;;  %v1402_v23 = vmul.f32 1.442695, %v1381_v44 }
 0x3d5   : > { %2664 = vpow2.f32 %v1402_v23 }
 0x3d9   : > { %v2659_v60 = vpop.eup %2658 }
 0x3da   : > { %v3546_v2 = vpop.xlane.xlu0 %1364  ;;  %1436 = vadd.xlane.f32.xlu0 %v2659_v60 }
 0x3db   : > { %v2661_v15 = vpop.eup %2660  ;;  %v1386_v25 = vsub.f32 %v3431_v30, %v3546_v2 }
 0x3dc   : > { %v3550_v17 = vpop.xlane.xlu1 %1366  ;;  %1438 = vadd.xlane.f32.xlu1 %v2661_v15 }
 0x3dd   : > { %v2663_v19 = vpop.eup %2662  ;;  %v1412_v21 = vmul.f32 1.442695, %v1386_v25  ;;  %v1387_v1 = vsub.f32 %v3433_v32, %v3550_v17 }
 0x3de   : > { %v3552_v22 = vpop.xlane.xlu0 %1360  ;;  %1432 = vadd.xlane.f32.xlu0 %v2663_v19 }
 0x3df   : > { %v2665_v26 = vpop.eup %2664  ;;  %2666 = vpow2.f32 %v1412_v21  ;;  %v1384_v24 = vsub.f32 %v3436_v35, %v3552_v22  ;;  %v1414_v31 = vmul.f32 1.442695, %v1387_v1 }
 0x3e0   : > { %v3558_v27 = vpop.xlane.xlu1 %1362  ;;  %1434 = vadd.xlane.f32.xlu1 %v2665_v26 }
 0x3e1   : > { %v1408_v28 = vmul.f32 1.442695, %v1384_v24  ;;  %v1385_v13 = vsub.f32 %v3438_v36, %v3558_v27 }
 0x3e3   : > { %2668 = vpow2.f32 %v1408_v28  ;;  %v1410_v16 = vmul.f32 1.442695, %v1385_v13 }
 0x3e5   : > { %2670 = vpow2.f32 %v1410_v16 }
 0x3e6   : > { %2672 = vpow2.f32 %v1414_v31 }
 0x3e9   : > { %v2667_v39 = vpop.eup %2666 }
 0x3ea   : > { %v3562_v37 = vpop.xlane.xlu0 %1372  ;;  %1444 = vadd.xlane.f32.xlu0 %v2667_v39 }
 0x3eb   : > { %v1390_v20 = vsub.f32 %v3449_v43, %v3562_v37 }
 0x3ec   : > { %v3566_v42 = vpop.xlane.xlu1 %1374 }
 0x3ed   : > { %v2669_v44 = vpop.eup %2668  ;;  %v1420_v23 = vmul.f32 1.442695, %v1390_v20  ;;  %v1391_v60 = vsub.f32 %v3451_v46, %v3566_v42  ;;  %v2235_v20 = vsel %vm1562_vm10, 1.0, %v2911_v14  ;;  %vm1708_vm10 = vcmp.ge.s32.totalorder %v3354_v9, 0 }
 0x3ee   : > { %1440 = vadd.xlane.f32.xlu1 %v2669_v44  ;;  %v3570_v15 = vpop.xlane.xlu0 %1368  ;;  %v1610_v45 = vmul.f32 %v2235_v20, %v3436_v35 }
 0x3ef   : > { %v2671_v25 = vpop.eup %2670  ;;  %2674 = vpow2.f32 %v1420_v23  ;;  %v1422_v19 = vmul.f32 1.442695, %v1391_v60  ;;  %v1388_v21 = vsub.f32 %v3454_v48, %v3570_v15  ;;  %v2236_v23 = vsel %vm1563_vm11, 1.0, %v2911_v14 }
 0x3f0   : > { %v3574_v26 = vpop.xlane.xlu1 %1370  ;;  %1442 = vadd.xlane.f32.xlu0 %v2671_v25  ;;  %v2673_v1 = vpop.eup %2672  ;;  %v2237_v60 = vsel %vm1564_vm13, 1.0, %v2911_v14  ;;  %v1611_v47 = vmul.f32 %v2236_v23, %v3438_v36  ;;  %vm1709_vm11 = vcmp.ge.s32.totalorder %v3302_v57, 0 }
 0x3f1   : > { %2676 = vpow2.f32 %v1422_v19  ;;  %v1416_v24 = vmul.f32 1.442695, %v1388_v21  ;;  %v1389_v28 = vsub.f32 %v3456_v49, %v3574_v26  ;;  %v1612_v51 = vmul.f32 %v2237_v60, %v3431_v30 }
 0x3f2   : > { %1446 = vadd.xlane.f32.xlu1 %v2673_v1  ;;  %v2239_v19 = vsel %vm1566_vm0, 1.0, %v2911_v14  ;;  %v2240_v21 = vsel %vm1567_vm1, 1.0, %v2911_v14  ;;  %vm1710_vm0 = vcmp.ge.s32.totalorder %v3358_v10, 0 }
 0x3f3   : > { %2678 = vpow2.f32 %v1416_v24  ;;  %v1418_v13 = vmul.f32 1.442695, %v1389_v28  ;;  %v1614_v36 = vmul.f32 %v2239_v19, %v3454_v48  ;;  %v1615_v30 = vmul.f32 %v2240_v21, %v3456_v49 }
 0x3f4   : > { %v1550_v25 = vpop.permute.xlu1 %1549  ;;  %v1659_v28 = vadd.s32 64, %v3224_v34  ;;  %v1660_v48 = vadd.s32 72, %v3224_v34 }
 0x3f5   : > { %2680 = vpow2.f32 %v1418_v13  ;;  %vm1568_vm3 = vcmp.eq.s32.totalorder %v3476_v61, %v1550_v25  ;;  %v3938_v13 = vmov 0 }
 0x3f6   : > { %v1553_v35 = vpop.permute.xlu0 %1552  ;;  %v2241_v56 = vsel %vm1568_vm3, 1.0, %v2911_v14  ;;  %v1677_v49 = vadd.s32 %v3280_v41, %v1660_v48 }
 0x3f7   : > { %vm1569_vm5 = vcmp.eq.s32.totalorder %v3476_v61, %v1553_v35  ;;  %v1616_v24 = vmul.f32 %v2241_v56, %v3449_v43  ;;  %v1676_v61 = vadd.s32 %v3280_v41, %v1659_v28  ;;  %v3936_v43 = vmov 0 }
 0x3f8   : > { %v2242_v1 = vsel %vm1569_vm5, 1.0, %v2911_v14  ;;  %v1661_v14 = vadd.s32 80, %v3224_v34  ;;  %vm1693_vm1 = vcmp.lt.s32.totalorder %v1677_v49, 200  ;;  %vm1711_vm5 = vcmp.ge.s32.totalorder %v3328_v3, 0 }
 0x3f9   : > { %v2675_v31 = vpop.eup %2674  ;;  %v1617_v32 = vmul.f32 %v2242_v1, %v3451_v46  ;;  %vm1692_vm13 = vcmp.lt.s32.totalorder %v1676_v61, 200  ;;  %v1662_v46 = vadd.s32 88, %v3224_v34  ;;  %vm3622_vm3 = vmand %vm1693_vm1, %vm1709_vm11  ;;  %vm1712_vm11 = vcmp.ge.s32.totalorder %v3362_v11, 0 }
 0x3fa   : > { %1452 = vadd.xlane.f32.xlu0 %v2675_v31  ;;  %vm3615_vm14 = vmand %vm1692_vm13, %vm1708_vm10  ;;  %v1678_v9 = vadd.s32 %v3280_v41, %v1661_v14  ;;  %v3939_v13 = vsel %vm3622_vm3, 4294967295, %v3938_v13  ;;  %v1664_v3 = vadd.s32 104, %v3224_v34  ;;  %vm1713_vm1 = vcmp.ge.s32.totalorder %v3350_v8, 0 }
 0x3fb   : > { %v2677_v16 = vpop.eup %2676  ;;  %v3937_v43 = vsel %vm3615_vm14, 4294967295, %v3936_v43  ;;  %v1679_v57 = vadd.s32 %v3280_v41, %v1662_v46 }
 0x3fc   : > { %1454 = vadd.xlane.f32.xlu1 %v2677_v16  ;;  %vm1694_vm4 = vcmp.lt.s32.totalorder %v1678_v9, 200  ;;  %v1663_v16 = vadd.s32 96, %v3224_v34  ;;  %v1681_v20 = vadd.s32 %v3280_v41, %v1664_v3 }
 0x3fd   : > { %v2679_v39 = vpop.eup %2678  ;;  %vm3628_vm10 = vmand %vm1694_vm4, %vm1710_vm0  ;;  %vm1695_vm13 = vcmp.lt.s32.totalorder %v1679_v57, 200 }
 0x3fe   : > { %1448 = vadd.xlane.f32.xlu0 %v2679_v39  ;;  %vm3632_vm14 = vmand %vm1695_vm13, %vm1711_vm5  ;;  %v1680_v39 = vadd.s32 %v3280_v41, %v1663_v16  ;;  %vm1697_vm0 = vcmp.lt.s32.totalorder %v1681_v20, 200 }
 0x3ff   : > { %v2681_v44 = vpop.eup %2680  ;;  %vm3646_vm5 = vmand %vm1697_vm0, %vm1713_vm1 }
 0x400   : > { %1450 = vadd.xlane.f32.xlu1 %v2681_v44  ;;  %vm1696_vm3 = vcmp.lt.s32.totalorder %v1680_v39, 200 }
 0x401   : > { %vm3642_vm4 = vmand %vm1696_vm3, %vm1712_vm11  ;;  %vm1764_vm3 = vcmask 7168  }
 0x402   : > { %1634 = vadd.xlane.f32.xlu0 %v1610_v45 }
 0x404   : > { %1636 = vadd.xlane.f32.xlu1 %v1611_v47 }
 0x406   : > { %1638 = vadd.xlane.f32.xlu0 %v1612_v51 }
 0x408   : > { %1640 = vadd.xlane.f32.xlu1 %v1613_v55 }
 0x40a   : > { %1642 = vadd.xlane.f32.xlu0 %v1614_v36 }
 0x40c   : > { %1644 = vadd.xlane.f32.xlu1 %v1615_v30 }
 0x40e   : > { %1646 = vadd.xlane.f32.xlu0 %v1616_v24 }
 0x410   : > { %1648 = vadd.xlane.f32.xlu1 %v1617_v32 }
 0x423   : > { %v1619_v45 = vpop.xlane.xlu0 %1618 }
 0x425   : > { %v1621_v11 = vpop.xlane.xlu1 %1620 }
 0x427   : > { %v1623_v60 = vpop.xlane.xlu0 %1622 }
 0x429   : > { %v1625_v47 = vpop.xlane.xlu1 %1624 }
 0x42b   : > { %v3650_v50 = vpop.xlane.xlu0 %1626 }
 0x42d   : > { %v3652_v8 = vpop.xlane.xlu1 %1628 }
 0x42f   : > { %v1631_v25 = vpop.xlane.xlu0 %1630 }
 0x431   : > { %v1633_v51 = vpop.xlane.xlu1 %1632 }
 0x457   : > { %v1429_v19 = vpop.xlane.xlu0 %1428 }
 0x458   : > { %2682 = vlog2.f32 %v1429_v19 }
 0x45b   : > { %v1431_v35 = vpop.xlane.xlu1 %1430  ;;  %v1425_v55 = vpop.xlane.xlu0 %1424 }
 0x45c   : > { %2684 = vlog2.f32 %v1431_v35 }
 0x45d   : > { %2686 = vlog2.f32 %v1425_v55 }
 0x45f   : > { %v1427_v21 = vpop.xlane.xlu1 %1426 }
 0x460   : > { %2688 = vlog2.f32 %v1427_v21 }
 0x462   : > { %v2683_v36 = vpop.eup %2682 }
 0x463   : > { %v1461_v56 = vmul.f32 0.6931472, %v2683_v36 }
 0x465   : > { %v1490_v30 = vadd.f32 %v1461_v56, %v3514_v59 }
 0x466   : > { %v2685_v1 = vpop.eup %2684 }
 0x467   : > { %v2687_v24 = vpop.eup %2686  ;;  %v1734_v28 = vsub.f32 %v1490_v30, %v1623_v60  ;;  %v1463_v32 = vmul.f32 0.6931472, %v2685_v1  ;;  %v1437_v61 = vpop.xlane.xlu0 %1436 }
 0x468   : > { %v1457_v48 = vmul.f32 0.6931472, %v2687_v24  ;;  %2690 = vlog2.f32 %v1437_v61 }
 0x469   : > { %v1750_v49 = vsel %vm3304_vm9, %v1734_v28, 0.0  ;;  %v1491_v14 = vadd.f32 %v1463_v32, %v3522_v18  ;;  %v1439_v9 = vpop.xlane.xlu1 %1438  ;;  %vm3949_vm9 = vnez %v3937_v43 }
 0x46a   : > { %v2689_v46 = vpop.eup %2688  ;;  %1767 = vst.msk [vmem:[%s3659_s11 + $0x10] sm:$0xff] %vm1764_vm3, %v1750_v49  ;;  %v1488_v59 = vadd.f32 %v1457_v48, %v3518_v63  ;;  %2692 = vlog2.f32 %v1439_v9 }
 0x46b   : > { %v1735_v57 = vsub.f32 %v1491_v14, %v1625_v47  ;;  %v1459_v16 = vmul.f32 0.6931472, %v2689_v46  ;;  %v1433_v39 = vpop.xlane.xlu0 %1432 }
 0x46c   : > { %v1732_v58 = vsub.f32 %v1488_v59, %v1619_v45  ;;  %2694 = vlog2.f32 %v1433_v39 }
 0x46d   : > { %v1751_v18 = vsel %vm3321_vm15, %v1735_v57, 0.0  ;;  %v1489_v3 = vadd.f32 %v1459_v16, %v3526_v33  ;;  %v1435_v20 = vpop.xlane.xlu1 %1434  ;;  %vm1714_vm15 = vcmp.ge.s32.totalorder %v3468_v52, 0 }
 0x46e   : > { %1768 = vst.msk [vmem:[%s3659_s11 + $0x18] sm:$0xff] %vm1764_vm3, %v1751_v18  ;;  %v1748_v60 = vsel %vm3313_vm12, %v1732_v58, 0.0  ;;  %2696 = vlog2.f32 %v1435_v20  ;;  %v1665_v18 = vadd.s32 112, %v3224_v34  ;;  %vm3950_vm12 = vnez %v3939_v13 }
 0x46f   : > { %1765 = vst.msk [vmem:[%s3659_s11] sm:$0xff] %vm1764_vm3, %v1748_v60  ;;  %v1733_v63 = vsub.f32 %v1489_v3, %v1621_v11 }
 0x471   : > { %v1749_v47 = vsel %vm3295_vm6, %v1733_v63, 0.0  ;;  %vm3948_vm6 = vnez %v3931_v5 }
 0x472   : > { %v2691_v45 = vpop.eup %2690  ;;  %1766 = vst.msk [vmem:[%s3659_s11 + $0x8] sm:$0xff] %vm1764_vm3, %v1749_v47  ;;  %v1666_v47 = vadd.s32 120, %v3224_v34 }
 0x473   : > { %v1469_v0 = vmul.f32 0.6931472, %v2691_v45 }
 0x474   : > { %v2693_v19 = vpop.eup %2692 }
 0x475   : > { %v1494_v33 = vadd.f32 %v1469_v0, %v3530_v12  ;;  %v1471_v35 = vmul.f32 0.6931472, %v2693_v19 }
 0x476   : > { %v2695_v55 = vpop.eup %2694 }
 0x477   : > { %v1738_v62 = vsub.f32 %v1494_v33, %v1631_v25  ;;  %v1495_v21 = vadd.f32 %v1471_v35, %v3534_v29  ;;  %v1465_v36 = vmul.f32 0.6931472, %v2695_v55  ;;  %v1445_v24 = vpop.xlane.xlu0 %1444  ;;  %v1682_v33 = vadd.s32 %v3280_v41, %v1665_v18 }
 0x478   : > { %v2697_v56 = vpop.eup %2696 }
 0x479   : > { %v1754_v54 = vsel %vm3340_vm7, %v1738_v62, 0.0  ;;  %v1739_v11 = vsub.f32 %v1495_v21, %v1633_v51  ;;  %v1492_v30 = vadd.f32 %v1465_v36, %v3538_v38  ;;  %v1467_v1 = vmul.f32 0.6931472, %v2697_v56 }
 0x47a   : > { %1771 = vst.msk [vmem:[%s3659_s11 + $0x30] sm:$0xff] %vm1764_vm3, %v1754_v54  ;;  %v1683_v21 = vadd.s32 %v3280_v41, %v1666_v47  ;;  %vm1715_vm7 = vcmp.ge.s32.totalorder %v3472_v53, 0 }
 0x47b   : > { %v1755_v12 = vsel %vm3345_vm8, %v1739_v11, 0.0  ;;  %v1736_v25 = vsub.f32 %v1492_v30, %v3650_v50  ;;  %v1493_v29 = vadd.f32 %v1467_v1, %v3542_v40  ;;  %v1441_v28 = vpop.xlane.xlu1 %1440 }
 0x47c   : > { %1772 = vst.msk [vmem:[%s3659_s11 + $0x38] sm:$0xff] %vm1764_vm3, %v1755_v12  ;;  %2698 = vlog2.f32 %v1441_v28  ;;  %vm1699_vm8 = vcmp.lt.s32.totalorder %v1683_v21, 200 }
 0x47d   : > { %v1752_v6 = vsel %vm3332_vm2, %v1736_v25, 0.0  ;;  %v1737_v38 = vsub.f32 %v1493_v29, %v3652_v8  ;;  %v1443_v51 = vpop.xlane.xlu0 %1442  ;;  %vm1698_vm2 = vcmp.lt.s32.totalorder %v1682_v33, 200 }
 0x47e   : > { %1769 = vst.msk [vmem:[%s3659_s11 + $0x20] sm:$0xff] %vm1764_vm3, %v1752_v6  ;;  %2700 = vlog2.f32 %v1443_v51 }
 0x47f   : > { %v1753_v7 = vsel %vm3948_vm6, %v1737_v38, 0.0  ;;  %v1447_v50 = vpop.xlane.xlu1 %1446  ;;  %2702 = vlog2.f32 %v1445_v24 }
 0x480   : > { %1770 = vst.msk [vmem:[%s3659_s11 + $0x28] sm:$0xff] %vm1764_vm3, %v1753_v7  ;;  %2704 = vlog2.f32 %v1447_v50 }
 0x486   : > { %v2699_v40 = vpop.eup %2698 }
 0x487   : > { %v1453_v32 = vpop.xlane.xlu0 %1452  ;;  %v1473_v48 = vmul.f32 0.6931472, %v2699_v40 }
 0x488   : > { %v2701_v61 = vpop.eup %2700  ;;  %2706 = vlog2.f32 %v1453_v32 }
 0x489   : > { %v1455_v4 = vpop.xlane.xlu1 %1454  ;;  %v2703_v8 = vpop.eup %2702  ;;  %v1475_v14 = vmul.f32 0.6931472, %v2701_v61  ;;  %v1496_v59 = vadd.f32 %v1473_v48, %v3552_v22 }
 0x48a   : > { %2708 = vlog2.f32 %v1455_v4  ;;  %v2705_v9 = vpop.eup %2704  ;;  %v1477_v46 = vmul.f32 0.6931472, %v2703_v8 }
 0x48b   : > { %v1449_v49 = vpop.xlane.xlu0 %1448  ;;  %v1479_v16 = vmul.f32 0.6931472, %v2705_v9  ;;  %v1497_v58 = vadd.f32 %v1475_v14, %v3558_v27 }
 0x48c   : > { %2710 = vlog2.f32 %v1449_v49  ;;  %v1498_v63 = vadd.f32 %v1477_v46, %v3546_v2 }
 0x48d   : > { %v1451_v5 = vpop.xlane.xlu1 %1450  ;;  %v1499_v19 = vadd.f32 %v1479_v16, %v3550_v17 }
 0x48e   : > { %2712 = vlog2.f32 %v1451_v5 }
 0x48f   : > { %v1635_v57 = vpop.xlane.xlu0 %1634 }
 0x490   : > { %v1740_v39 = vsub.f32 %v1496_v59, %v1635_v57 }
 0x491   : > { %v1637_v3 = vpop.xlane.xlu1 %1636 }
 0x492   : > { %v1756_v20 = vsel %vm3949_vm9, %v1740_v39, 0.0  ;;  %v1741_v60 = vsub.f32 %v1497_v58, %v1637_v3  ;;  %v2707_v45 = vpop.eup %2706 }
 0x493   : > { %1773 = vst.msk [vmem:[%s3659_s11 + $0x40] sm:$0xff] %vm1764_vm3, %v1756_v20  ;;  %v1639_v22 = vpop.xlane.xlu0 %1638  ;;  %v1485_v34 = vmul.f32 0.6931472, %v2707_v45 }
 0x494   : > { %v1757_v0 = vsel %vm3950_vm12, %v1741_v60, 0.0  ;;  %v1742_v27 = vsub.f32 %v1498_v63, %v1639_v22  ;;  %v2709_v43 = vpop.eup %2708 }
 0x495   : > { %1774 = vst.msk [vmem:[%s3659_s11 + $0x48] sm:$0xff] %vm1764_vm3, %v1757_v0  ;;  %v1641_v2 = vpop.xlane.xlu1 %1640  ;;  %v1487_v56 = vmul.f32 0.6931472, %v2709_v43  ;;  %v1502_v41 = vadd.f32 %v1485_v34, %v3562_v37 }
 0x496   : > { %v2711_v35 = vpop.eup %2710  ;;  %v1758_v55 = vsel %vm3628_vm10, %v1742_v27, 0.0  ;;  %v1743_v62 = vsub.f32 %v1499_v19, %v1641_v2  ;;  %vm1731_vm10 = vmand %vm1699_vm8, %vm1715_vm7 }
 0x497   : > { %v1481_v13 = vmul.f32 0.6931472, %v2711_v35  ;;  %1775 = vst.msk [vmem:[%s3659_s11 + $0x50] sm:$0xff] %vm1764_vm3, %v1758_v55  ;;  %v1643_v36 = vpop.xlane.xlu0 %1642  ;;  %v1503_v12 = vadd.f32 %v1487_v56, %v3566_v42 }
 0x498   : > { %v2713_v17 = vpop.eup %2712  ;;  %v1759_v54 = vsel %vm3632_vm14, %v1743_v62, 0.0  ;;  %vm1730_vm14 = vmand %vm1698_vm2, %vm1714_vm15 }
 0x499   : > { %v1483_v11 = vmul.f32 0.6931472, %v2713_v17  ;;  %1776 = vst.msk [vmem:[%s3659_s11 + $0x58] sm:$0xff] %vm1764_vm3, %v1759_v54  ;;  %v1500_v31 = vadd.f32 %v1481_v13, %v3570_v15  ;;  %v1645_v30 = vpop.xlane.xlu1 %1644 }
 0x49b   : > { %v1744_v52 = vsub.f32 %v1500_v31, %v1643_v36  ;;  %v1501_v1 = vadd.f32 %v1483_v11, %v3574_v26  ;;  %v1647_v10 = vpop.xlane.xlu0 %1646  ;;  %1792 = sbr.rel (!%p3951_p10) target bundleno = 1214 (0x4be), region = 64 }
 0x49c   : > { %v1746_v24 = vsub.f32 %v1502_v41, %v1647_v10 }
 0x49d   : > { %v1760_v15 = vsel %vm3642_vm4, %v1744_v52, 0.0  ;;  %v1745_v25 = vsub.f32 %v1501_v1, %v1645_v30  ;;  %v1649_v53 = vpop.xlane.xlu1 %1648 }
 0x49e   : > { %1777 = vst.msk [vmem:[%s3659_s11 + $0x60] sm:$0xff] %vm1764_vm3, %v1760_v15  ;;  %v1762_v37 = vsel %vm1730_vm14, %v1746_v24, 0.0  ;;  %v1747_v29 = vsub.f32 %v1503_v12, %v1649_v53 }
 0x49f   : > { %v1761_v26 = vsel %vm3646_vm5, %v1745_v25, 0.0  ;;  %1779 = vst.msk [vmem:[%s3659_s11 + $0x70] sm:$0xff] %vm1764_vm3, %v1762_v37 }
 0x4a0   : > { %1778 = vst.msk [vmem:[%s3659_s11 + $0x68] sm:$0xff] %vm1764_vm3, %v1761_v26  ;;  %v1763_v28 = vsel %vm1731_vm10, %v1747_v29, 0.0 }
 0x4a1   : > { %1780 = vst.msk [vmem:[%s3659_s11 + $0x78] sm:$0xff] %vm1764_vm3, %v1763_v28 }
 0x4a2   : > { %s3963_s27 = smov (!%p1795_p1, %s1794_s27), 16 }
 0x4a3   : > { %s3745_s28 = sshll.u32 %s3963_s27, 6 }
 0x4a4   : > { %s1799_s29 = ssub.s32 1024, %s3745_s28 }
 0x4a5   : > { %1800 = vsyncadd %s1782_s26, %s1799_s29  ;;  %p2247_p2 = scmp.ne.s32.totalorder %s3745_s28, 0  ;;  %s2284_s14 = sshll.u32 %s2986_s13, 10 }
 0x4a6   : > { %s3755_s23 = scalar_lea.hbm %s3901_s8, %s2284_s14  ;;  %s1805_s15 = sshll.u32 %s3407_s18, 4  ;;  %s3758_s15 = int_to_ptr.vmem [resolvable:$true] %s1805_s15 }
 0x4a7   : > { %s2770_s24 = scalar_lea.vmem %s3758_s15, %s3745_s28  ;;  %s2912_s27 = smov [#allocation7]  }
 0x4a8   : > { %p2771_p3 = scmp.ne.s32.totalorder %s3758_s15, %s2770_s24  ;;  %s2774_s29 = sshll.u32 %s2912_s27, 4  ;;  %s2775_s29 = int_to_ptr.vmem [resolvable:$false] %s2774_s29 }
 0x4a9   : > { %s2776_s13 = scalar_lea.vmem %s2775_s29, 2048  ;;  %p2777_p8 = scmp.lt.s32.totalorder %s3758_s15, %s2775_s29 }
 0x4aa   : > { %p2772_p4 = pnand %p2771_p3, %p2247_p2  ;;  %p2778_p11 = scmp.lt.s32.totalorder %s2776_s13, %s2770_s24 }
 0x4ac   : > { %p2773_p7 = pneg %p2772_p4  ;;  %p2779_p13 = por %p2778_p11, %p2777_p8 }
 0x4ae   : > { %p2780_p5 = pnand %p2779_p13, %p2773_p7 }
 0x4b0   : > { %2783 = shalt.err (!%p2780_p5)
}
 0x4b1   : > { %s2784_s18 = scalar_lea.hbm %s3755_s23, %s3745_s28  ;;  %s2788_s25 = scalar_lea.hbm %s3901_s8, 1600 }
 0x4b2   : > { %p2785_p0 = scmp.ne.s32.totalorder %s3755_s23, %s2784_s18  ;;  %p2789_p12 = scmp.lt.u32.totalorder %s3755_s23, %s3901_s8 }
 0x4b3   : > { %p2790_p10 = scmp.lt.u32.totalorder %s2788_s25, %s2784_s18  ;;  %p2792_p3 = scmp.lt.u32.totalorder %s2784_s18, %s3755_s23 }
 0x4b4   : > { %p2786_p6 = pnand %p2785_p0, %p2247_p2 }
 0x4b5   : > { %p2791_p1 = por %p2790_p10, %p2789_p12 }
 0x4b6   : > { %p2787_p9 = pneg %p2786_p6 }
 0x4b7   : > { %p2793_p4 = por %p2792_p3, %p2791_p1 }
 0x4b9   : > { %p2794_p7 = pnand %p2793_p4, %p2787_p9 }
 0x4bb   : > { %2797 = shalt.err (!%p2794_p7)
}
 0x4bc   : > { %s2913_s29 = smov 64   ;;  %s2914_s13 = smov 4  }
 0x4bd   : > { %1811 = dma.vmem_to_hbm [thread:$0]  (%p2247_p2), %s3758_s15, %s3745_s28, %s3755_s23, %s1782_s26, %s2913_s29, %s2913_s29, %s2914_s13  }
 0x4be PF: > { %p3952_p8 = scmp.ne.s32.totalorder %s3911_s19, 0 }
 0x4bf   : > { %s1816_s18 = ssub.s32 (%p3952_p8), 25, %s3101_s22  ;;  %s3793_s25 = scalar_lea.vmem (%p3952_p8), %s3902_s9, %s3268_s21  }
 0x4c0   : > { %1814 = sbr.rel (!%p3952_p8) target bundleno = 1272 (0x4f8), region = 68  ;;  %p1817_p11 = scmp.lt.s32.totalorder (%p3952_p8), %s1816_s18, 16 }
 0x4c7   : > { %s3965_s18 = smov (!%p1817_p11, %s1816_s18), 16 }
 0x4c8   : > { %s2252_s27 = sshll.u32 %s3965_s18, 7 }
 0x4c9   : > { %p2255_p13 = scmp.eq.s32.totalorder %s2252_s27, 0 }
 0x4ca   : > { %s3799_s17 = sshrl.u32 (!%p2255_p13), %s3965_s18, 4 }
 0x4cb   : > { %1825 = sbr.rel (%p2255_p13) target bundleno = 1272 (0x4f8), region = 72  ;;  %p2256_p2 = scmp.le.s32.totalorder (!%p2255_p13), %s3799_s17, 0 }
 0x4d2   : > { %2068 = sbr.rel (%p2256_p2) target bundleno = 1251 (0x4e3), region = 163  ;;  %s3953_s19 = smov (!%p2256_p2), %s3793_s25 }
 0x4d3   : > { %s3954_s22 = smov (!%p2256_p2), %s3659_s11  ;;  %s3808_s21 = smov (!%p2256_p2), 0  }
 0x4d4   : > { %s3810_s26 = smov (!%p2256_p2), 0  }
 0x4d9 LB: >> { %v1917_v42 = vld [vmem:[%s2880_s22] sm:$0xff]  ;;  %v1919_v44 = vld [vmem:[%s2880_s22 + $0x8] sm:$0xff]  ;;  %v1921_v23 = vld [vmem:[%s2880_s22 + $0x10] sm:$0xff]  ;;  %s1949_s28 = sadd.s32 1, %s2884_s21  ;;  %s1911_s26 = sadd.s32 1, %s2888_s26   ;;  %s2888_s26 = sphi %s3810_s26, %s1911_s26   ;;  %s2884_s21 = sphi %s3808_s21, %s3955_s21   ;;  %s2880_s22 = sphi %s3954_s22, %s1954_s22   ;;  %s2876_s19 = sphi %s3953_s19, %s1955_s19  }
 0x4da   : >> { %1918 = vst [vmem:[%s2876_s19] sm:$0xff] %v1917_v42  ;;  %1920 = vst [vmem:[%s2876_s19 + $0x8] sm:$0xff] %v1919_v44  ;;  %v1923_v6 = vld [vmem:[%s2880_s22 + $0x18] sm:$0xff]  ;;  %v1925_v38 = vld [vmem:[%s2880_s22 + $0x20] sm:$0xff]  ;;  %p1950_p5 = scmp.ge.s32.totalorder %s1949_s28, %s3799_s17  ;;  %p1910_p0 = scmp.ge.s32.totalorder %s1911_s26, %s3799_s17 }
 0x4db   : >> { %1922 = vst [vmem:[%s2876_s19 + $0x10] sm:$0xff] %v1921_v23  ;;  %v1927_v51 = vld [vmem:[%s2880_s22 + $0x28] sm:$0xff]  ;;  %1924 = vst [vmem:[%s2876_s19 + $0x18] sm:$0xff] %v1923_v6  ;;  %v1929_v7 = vld [vmem:[%s2880_s22 + $0x30] sm:$0xff] }
 0x4dc   : >> { %1926 = vst [vmem:[%s2876_s19 + $0x20] sm:$0xff] %v1925_v38  ;;  %1928 = vst [vmem:[%s2876_s19 + $0x28] sm:$0xff] %v1927_v51  ;;  %v1931_v50 = vld [vmem:[%s2880_s22 + $0x38] sm:$0xff]  ;;  %v1933_v40 = vld [vmem:[%s2880_s22 + $0x40] sm:$0xff]  ;;  %s3967_s28 = smov (%p1950_p5, %s1949_s28), 0  ;;  %1913 = sbr.rel (!%p1910_p0) target bundleno = 1241 (0x4d9), region = 169 }
 0x4dd   : >> { %1930 = vst [vmem:[%s2876_s19 + $0x30] sm:$0xff] %v1929_v7  ;;  %1932 = vst [vmem:[%s2876_s19 + $0x38] sm:$0xff] %v1931_v50  ;;  %v1935_v32 = vld [vmem:[%s2880_s22 + $0x48] sm:$0xff]  ;;  %v1937_v61 = vld [vmem:[%s2880_s22 + $0x50] sm:$0xff]  ;;  %s2257_s23 = sshll.u32 %s3967_s28, 7  ;;  %s3955_s21 = smov %s3967_s28 }
 0x4de   : >> { %1934 = vst [vmem:[%s2876_s19 + $0x40] sm:$0xff] %v1933_v40  ;;  %v1939_v4 = vld [vmem:[%s2880_s22 + $0x58] sm:$0xff]  ;;  %1936 = vst [vmem:[%s2876_s19 + $0x48] sm:$0xff] %v1935_v32  ;;  %v1941_v48 = vld [vmem:[%s2880_s22 + $0x60] sm:$0xff] }
 0x4df   : >> { %1938 = vst [vmem:[%s2876_s19 + $0x50] sm:$0xff] %v1937_v61  ;;  %1940 = vst [vmem:[%s2876_s19 + $0x58] sm:$0xff] %v1939_v4  ;;  %v1943_v8 = vld [vmem:[%s2880_s22 + $0x68] sm:$0xff]  ;;  %v1945_v49 = vld [vmem:[%s2880_s22 + $0x70] sm:$0xff] }
 0x4e0   : >> { %1942 = vst [vmem:[%s2876_s19 + $0x60] sm:$0xff] %v1941_v48  ;;  %1944 = vst [vmem:[%s2876_s19 + $0x68] sm:$0xff] %v1943_v8  ;;  %v1947_v14 = vld [vmem:[%s2880_s22 + $0x78] sm:$0xff]  ;;  %s1954_s22 = scalar_lea.vmem %s3659_s11, %s2257_s23 [#allocation8]  }
 0x4e1   : >> { %1946 = vst [vmem:[%s2876_s19 + $0x70] sm:$0xff] %v1945_v49  ;;  %1948 = vst [vmem:[%s2876_s19 + $0x78] sm:$0xff] %v1947_v14  ;;  %s1955_s19 = scalar_lea.vmem %s3793_s25, %s2257_s23  }
 0x4e3 PF: > { %s3868_s15 = sand.u32 15, %s3965_s18   ;;  %s2286_s24 = sshll.u32 %s3799_s17, 7 }
 0x4e4   : > { %s1960_s29 = scalar_lea.vmem %s3659_s11, %s2286_s24 [#allocation8]   ;;  %s1962_s13 = scalar_lea.vmem %s3793_s25, %s2286_s24  }
 0x4e5   : > { %p2262_p6 = scmp.le.s32.totalorder %s3868_s15, 0 }
 0x4e6   : > { %s2890_s14 = smov (!%p2262_p6), %s1962_s13   ;;  %s2894_s16 = smov (!%p2262_p6), %s1960_s29  }
 0x4e7   : > { %2082 = sbr.rel (%p2262_p6) target bundleno = 1272 (0x4f8), region = 174  ;;  %s2898_s27 = smov (!%p2262_p6), 0  }
 0x4e8   : > { %s2902_s28 = smov (!%p2262_p6), 0  }
 0x4ee LB: >> { %v1972_v9 = vld [vmem:[%s2896_s16] sm:$0xff]  ;;  %s1974_s18 = sadd.s32 1, %s2900_s27  ;;  %s1966_s28 = sadd.s32 1, %s2904_s28   ;;  %s2904_s28 = sphi %s2902_s28, %s1966_s28   ;;  %s2900_s27 = sphi %s2898_s27, %s2899_s27   ;;  %s2896_s16 = sphi %s2894_s16, %s1979_s16   ;;  %s2892_s14 = sphi %s2890_s14, %s1980_s14  }
 0x4ef   : >> { %1973 = vst [vmem:[%s2892_s14] sm:$0xff] %v1972_v9  ;;  %p1975_p9 = scmp.ge.s32.totalorder %s1974_s18, %s3868_s15  ;;  %p1965_p12 = scmp.ge.s32.totalorder %s1966_s28, %s3868_s15 }
 0x4f1   : >> { %s3969_s18 = smov (%p1975_p9, %s1974_s18), 0  ;;  %1968 = sbr.rel (!%p1965_p12) target bundleno = 1262 (0x4ee), region = 180 }
 0x4f2   : >> { %s2263_s11 = sshll.u32 %s3969_s18, 3  ;;  %s2899_s27 = smov %s3969_s18  }
 0x4f3   : >> { %s1979_s16 = scalar_lea.vmem %s1960_s29, %s2263_s11 [#allocation8]   ;;  %s1980_s14 = scalar_lea.vmem %s1962_s13, %s2263_s11  }
 0x4f8 PF: > { %p2471_p10 = scmp.ge.s32.totalorder %s2872_s12, 2  ;;  %s1992_s25 = sand.u32 1, %s2860_s30  }
 0x4f9   : > { %p3956_p1 = scmp.ne.s32.totalorder %s3912_s20, 0  ;;  %s1993_s17 = scalar_lea.sflag [#allocation4], %s1992_s25 }
 0x4fb   : > { %p2464_p3 = pnand %p2471_p10, %p3956_p1 }
 0x4fd   : > { %2855 = dma.done.wait (!%p2464_p3), %s1993_s17, 1024  }
 0x4fe   : > { %2857 = vsyncadd (!%p2464_p3), %s1993_s17, 4294966272  ;;  %s3957_s12 = sld [smem:[#allocation13_spill]]  ;;  %s3958_s19 = sld [smem:[#allocation12_spill]] }
 0x4ff   : > { %s3959_s11 = sld [smem:[#allocation14_spill]]  ;;  %s3960_s30 = smov %s2864_s10 }
 0x504   : > { %p22_p4 = scmp.ge.s32.totalorder %s3957_s12, 4   ;;  %s3961_s10 = smov %s3958_s19 }
 0x506   :  { %24 = sbr.rel (!%p22_p4) target bundleno = 5 (0x5), region = 191 }
 0x50d   :  { %2005 = vsyncpa [#allocation3], 1 }
 0x50e   :  { %2007 = vsyncpa [#allocation3 + $0x1], 1 }
 0x50f   :  { %2008 = vsyncpa [#allocation6], 1 }
 0x510   :  { %2009 = vsyncpa [#allocation4], 1 }
 0x511   :  { %2011 = vsyncpa [#allocation4 + $0x1], 1 }

</bundles_post_ra>
